<compile_context>
chip_gen: v5e
topology: v5e:2x2
jax: 0.10.0
libtpu: 0.0.40
codegen_flags: <defaults>
</compile_context>

<pallas_src>
import functools

import jax
import jax.numpy as jnp
from jax import lax
from jax.experimental import pallas as pl
from jax.experimental.pallas import tpu as pltpu


def _tree_sum(xs):
    """Balanced-tree sum of a list of equal-shape arrays (short dependency chain)."""
    while len(xs) > 1:
        nxt = []
        for i in range(0, len(xs) - 1, 2):
            nxt.append(xs[i] + xs[i + 1])
        if len(xs) % 2:
            nxt.append(xs[-1])
        xs = nxt
    return xs[0]


# ---------------------------------------------------------------------------
# Fused kernel: NB batch elements per grid step.
# ---------------------------------------------------------------------------
def _aligned_kernel(low_ref, high_ref, wdl_ref, wdh_ref, wflow_ref,
                    uxp_ref, uyp_ref, mask_ref, grid_ref,
                    out_ref, feat_ref,
                    *, C_in, C_out, Hh, Wh, Hl, Wl, P_pad, NB):
    f32 = jnp.float32
    bf16 = jnp.bfloat16
    W = NB * P_pad
    HC = Hh * C_in

    # ---- down_l (1x1 conv) on all NB batch segments at once (wide lanes) ---------
    low = low_ref[0]                                                    # (C_in, W) bf16
    low_d = jnp.dot(wdl_ref[...], low, preferred_element_type=f32)      # (C_out, W)
    feat_ref[C_out:2 * C_out, :] = low_d

    uxp = uxp_ref[...]                                                  # (Wh, W) bf16
    uyp = uyp_ref[...]                                                  # (Hh, W) f32

    # ---- bilinear upsample (align_corners=True) + down_h, per batch segment ------
    # Semi-separable: one MXU matmul over the source-W axis, then an unrolled VPU
    # weighted sum over the source-H axis (no dense (Q, P) matrix is ever built).
    # The 1x1 down_h conv commutes with the (linear) upsample, so it is applied after.
    for nb in range(NB):
        s0, s1 = nb * P_pad, (nb + 1) * P_pad
        hrm = high_ref[0, nb * HC:(nb + 1) * HC, :]                     # (Hh*C_in, Wh), rows a*C_in+c
        tu = jnp.dot(hrm, uxp[:, s0:s1], preferred_element_type=f32)    # (Hh*C_in, P_pad)
        uyp_s = uyp[:, s0:s1]
        up = _tree_sum([uyp_s[a:a + 1, :] * tu[a * C_in:(a + 1) * C_in, :]
                        for a in range(Hh)])                            # (C_in, P_pad)
        hud = jnp.dot(wdh_ref[...], up.astype(bf16),
                      preferred_element_type=f32)                       # (C_out, P_pad)
        feat_ref[0:C_out, s0:s1] = hud

    # ---- flow_make: 3x3 conv (padding=1) on concat([high_up, low_d]) -------------
    # ONE fused channel-mix matmul (M=18 rows = 9 taps x 2 flow channels), then one
    # full-width mask multiply (masks pre-shifted to source lanes host-side), 9 XLU
    # lane rolls, and a balanced-tree accumulation.
    mixed = jnp.dot(wflow_ref[...], feat_ref[...].astype(bf16),
                    preferred_element_type=f32)                         # (18, W)
    mixed = mixed * mask_ref[...]
    parts = []
    for k in range(9):
        off = (k // 3 - 1) * Wl + (k % 3 - 1)                           # flat source offset
        t = mixed[2 * k:2 * k + 2, :]                                   # (2, W): (dx, dy) rows
        if off % W != 0:
            t = pltpu.roll(t, (-off) % W, 1)                            # t'[p] = mixed[p + off]
        parts.append(t)
    flow_pix = _tree_sum(parts)                                         # (2, W), already in px units

    # ---- flow_warp: grid_sample(bilinear, align_corners=True, zeros padding) -----
    coord = grid_ref[...] + flow_pix                                    # (2, W): row0=x, row1=y px
    c0 = jnp.floor(coord)
    fr = coord - c0
    w1 = fr
    w0 = 1.0 - fr
    x0 = c0[0:1, :]
    y0 = c0[1:2, :]
    x1 = x0 + 1.0
    y1 = y0 + 1.0
    # zeros padding: fold per-corner validity into the 1-D weights (f32 throughout)
    wx0 = jnp.where((x0 >= 0.0) & (x0 <= Wh - 1.0), w0[0:1, :], 0.0)
    wx1 = jnp.where((x1 >= 0.0) & (x1 <= Wh - 1.0), w1[0:1, :], 0.0)
    wy0 = jnp.where((y0 >= 0.0) & (y0 <= Hh - 1.0), w0[1:2, :], 0.0)
    wy1 = jnp.where((y1 >= 0.0) & (y1 <= Hh - 1.0), w1[1:2, :], 0.0)
    x0i = jnp.clip(x0, 0.0, Wh - 1.0).astype(jnp.int32)
    x1i = jnp.clip(x1, 0.0, Wh - 1.0).astype(jnp.int32)
    y0i = jnp.clip(y0, 0.0, Hh - 1.0).astype(jnp.int32)
    y1i = jnp.clip(y1, 0.0, Hh - 1.0).astype(jnp.int32)

    ix = lax.broadcasted_iota(jnp.int32, (Wh, W), 0)
    iy = lax.broadcasted_iota(jnp.int32, (Hh, W), 0)
    ax = (jnp.where(ix == x0i, wx0, 0.0) +
          jnp.where(ix == x1i, wx1, 0.0)).astype(bf16)                  # (Wh, W)
    ay = (jnp.where(iy == y0i, wy0, 0.0) +
          jnp.where(iy == y1i, wy1, 0.0))                               # (Hh, W) f32

    # warp the ORIGINAL high-level feature, per batch segment (semi-separable again)
    for nb in range(NB):
        s0, s1 = nb * P_pad, (nb + 1) * P_pad
        hrm = high_ref[0, nb * HC:(nb + 1) * HC, :]                     # (Hh*C_in, Wh) bf16
        tw = jnp.dot(hrm, ax[:, s0:s1], preferred_element_type=f32)     # (Hh*C_in, P_pad)
        ay_s = ay[:, s0:s1]
        warp = _tree_sum([ay_s[a:a + 1, :] * tw[a * C_in:(a + 1) * C_in, :]
                          for a in range(Hh)])                          # (C_in, P_pad)
        out_ref[0, :, s0:s1] = warp


# ---------------------------------------------------------------------------
# Plain-JAX glue: precomputed small constants + layout plumbing.
# ---------------------------------------------------------------------------
def _upsample_matrix(out_size, in_size):
    """R[i, a] = bilinear (align_corners=True) weight of input row a for output row i."""
    if out_size == 1:
        src = jnp.zeros((1,), jnp.float32)
    else:
        src = jnp.arange(out_size, dtype=jnp.float32) * (in_size - 1) / (out_size - 1)
    i0f = jnp.floor(src)
    frac = src - i0f
    i0 = i0f.astype(jnp.int32)
    i1 = jnp.minimum(i0 + 1, in_size - 1)
    return (jax.nn.one_hot(i0, in_size, dtype=jnp.float32) * (1.0 - frac)[:, None] +
            jax.nn.one_hot(i1, in_size, dtype=jnp.float32) * frac[:, None])


def aligned_module_forward(low_feature, h_feature, w_down_l, w_down_h, w_flow):
    """low_feature (N,C_in,Hl,Wl), h_feature (N,C_in,Hh,Wh)  [NCHW, like PyTorch]."""
    N, C_in, Hl, Wl = low_feature.shape
    _, _, Hh, Wh = h_feature.shape
    C_out = w_down_l.shape[0]
    P = Hl * Wl
    P_pad = ((P + 127) // 128) * 128          # lane-dense stores
    pad = P_pad - P
    f32, bf16 = jnp.float32, jnp.bfloat16

    # batches per grid step: amortize per-step pipeline overhead, widen matmul lanes
    NB = 1
    for cand in (4, 2):
        if N % cand == 0:
            NB = cand
            break
    G = N // NB
    W = NB * P_pad

    # ---- feature layouts (bf16 for the MXU; accumulation stays f32 in-kernel) ----
    low_flat = jnp.pad(low_feature.reshape(N, C_in, P),
                       ((0, 0), (0, 0), (0, pad))).astype(bf16)
    low_g = low_flat.reshape(G, NB, C_in, P_pad).transpose(0, 2, 1, 3).reshape(G, C_in, W)
    # a-grouped high layout (rows = a*C_in + c): lets both the upsample and the warp
    # contract the source-W axis as a plain 2-D MXU matmul with no in-kernel relayout.
    high_rm = jnp.transpose(h_feature, (0, 2, 1, 3)).reshape(N, Hh * C_in, Wh).astype(bf16)
    high_g = high_rm.reshape(G, NB * Hh * C_in, Wh)

    # ---- weights ----
    wdl = w_down_l.reshape(C_out, C_in).astype(bf16)
    wdh = w_down_h.reshape(C_out, C_in).astype(bf16)
    # fold grid normalisation (1/Wl, 1/Hl) and pixel scaling (0.5*(Wh-1), 0.5*(Hh-1))
    # into the flow weights so the kernel's flow is directly in source-pixel units
    sx = 0.5 * (Wh - 1) / Wl
    sy = 0.5 * (Hh - 1) / Hl
    wflow18 = jnp.transpose(w_flow, (2, 3, 0, 1)).reshape(18, 2 * C_out).astype(f32)
    wflow18 = (wflow18 * jnp.tile(jnp.array([sx, sy], f32), 9)[:, None]).astype(bf16)

    # ---- per-output-pixel constants ----
    ii = jnp.repeat(jnp.arange(Hl, dtype=jnp.int32), Wl)     # (P,) output row
    jj = jnp.tile(jnp.arange(Wl, dtype=jnp.int32), Hl)       # (P,) output col
    Ry = _upsample_matrix(Hl, Hh)                            # (Hl, Hh)
    Rx = _upsample_matrix(Wl, Wh)                            # (Wl, Wh)
    uyp = jnp.tile(jnp.pad(Ry[ii, :].T, ((0, 0), (0, pad))), (1, NB)).astype(f32)   # (Hh, W)
    uxp = jnp.tile(jnp.pad(Rx[jj, :].T, ((0, 0), (0, pad))), (1, NB)).astype(bf16)  # (Wh, W)

    # 3x3-conv zero-padding masks, pre-shifted to SOURCE lane positions so one
    # full-width multiply before the in-kernel rolls reproduces the destination mask
    # exactly (contribution[p] = mixed[p+off] * mask_dest[p] for every lane p).
    masks = []
    for dy in range(3):
        for dx in range(3):
            off = (dy - 1) * Wl + (dx - 1)
            oi = ii + (dy - 1)
            oj = jj + (dx - 1)
            m = jnp.pad(((oi >= 0) & (oi < Hl) & (oj >= 0) & (oj < Wl)).astype(f32), (0, pad))
            m = jnp.roll(m, off)          # destination mask moved to the source lane
            masks.append(m)
            masks.append(m)               # same mask for both flow channels of this tap
    mask18 = jnp.tile(jnp.stack(masks), (1, NB))                                    # (18, W)

    # base sampling positions directly in source-pixel coordinates of the high feature
    gx_pix = jj.astype(f32) * (Wh - 1) / max(Wl - 1, 1)
    gy_pix = ii.astype(f32) * (Hh - 1) / max(Hl - 1, 1)
    grid_pix = jnp.tile(jnp.pad(jnp.stack([gx_pix, gy_pix]), ((0, 0), (0, pad))),
                        (1, NB))                                                    # (2, W)

    kernel = functools.partial(_aligned_kernel, C_in=C_in, C_out=C_out, Hh=Hh, Wh=Wh,
                               Hl=Hl, Wl=Wl, P_pad=P_pad, NB=NB)

    out_g = pl.pallas_call(
        kernel,
        out_shape=jax.ShapeDtypeStruct((G, C_in, W), f32),
        grid_spec=pltpu.PrefetchScalarGridSpec(
            num_scalar_prefetch=0,
            grid=(G,),
            in_specs=[
                pl.BlockSpec((1, C_in, W), lambda g: (g, 0, 0)),            # low (NB segs)
                pl.BlockSpec((1, NB * Hh * C_in, Wh), lambda g: (g, 0, 0)),  # high, a-grouped rows
                pl.BlockSpec((C_out, C_in), lambda g: (0, 0)),               # w_down_l
                pl.BlockSpec((C_out, C_in), lambda g: (0, 0)),               # w_down_h
                pl.BlockSpec((18, 2 * C_out), lambda g: (0, 0)),             # fused flow weights
                pl.BlockSpec((Wh, W), lambda g: (0, 0)),                     # upsample W weights
                pl.BlockSpec((Hh, W), lambda g: (0, 0)),                     # upsample H weights
                pl.BlockSpec((18, W), lambda g: (0, 0)),                     # 3x3 tap masks
                pl.BlockSpec((2, W), lambda g: (0, 0)),                      # base grid (px)
            ],
            out_specs=pl.BlockSpec((1, C_in, W), lambda g: (g, 0, 0)),
            scratch_shapes=[pltpu.VMEM((2 * C_out, W), f32)],                # concat feature
        ),
        compiler_params=pltpu.CompilerParams(
            dimension_semantics=("parallel",),      # independent batch groups -> megacore
            vmem_limit_bytes=32 * 1024 * 1024),
    )(low_g, high_g, wdl, wdh, wflow18, uxp, uyp, mask18, grid_pix)

    out = out_g.reshape(G, C_in, NB, P_pad).transpose(0, 2, 1, 3).reshape(N, C_in, P_pad)
    return out[:, :, :P].reshape(N, C_in, Hl, Wl)


# ---------------------------------------------------------------------------
# Pure-JAX reference (f32) for the correctness check.
# ---------------------------------------------------------------------------
def reference_forward(low_feature, h_feature, w_down_l, w_down_h, w_flow):
    N, C_in, Hl, Wl = low_feature.shape
    _, _, Hh, Wh = h_feature.shape
    wdl = w_down_l.reshape(w_down_l.shape[0], C_in)
    wdh = w_down_h.reshape(w_down_h.shape[0], C_in)
    low_d = jnp.einsum('oc,nchw->nohw', wdl, low_feature)
    high_d = jnp.einsum('oc,nchw->nohw', wdh, h_feature)
    Ry = _upsample_matrix(Hl, Hh)
    Rx = _upsample_matrix(Wl, Wh)
    high_up = jnp.einsum('ia,ncab,jb->ncij', Ry, high_d, Rx)
    feat = jnp.concatenate([high_up, low_d], axis=1)
    flow = lax.conv_general_dilated(feat, w_flow, window_strides=(1, 1),
                                    padding=((1, 1), (1, 1)),
                                    dimension_numbers=('NCHW', 'OIHW', 'NCHW'))
    gx = (2.0 * jnp.arange(Wl, dtype=jnp.float32) / (Wl - 1) - 1.0)[None, None, :] + flow[:, 0] / Wl
    gy = (2.0 * jnp.arange(Hl, dtype=jnp.float32) / (Hl - 1) - 1.0)[None, :, None] + flow[:, 1] / Hl
    x = (gx + 1.0) * 0.5 * (Wh - 1)
    y = (gy + 1.0) * 0.5 * (Hh - 1)
    x0 = jnp.floor(x)
    y0 = jnp.floor(y)
    wx1 = x - x0
    wx0 = 1.0 - wx1
    wy1 = y - y0
    wy0 = 1.0 - wy1
    n_idx = jnp.arange(N)[:, None, None]

    def tap(xc, yc, w):
        valid = (xc >= 0) & (xc <= Wh - 1) & (yc >= 0) & (yc <= Hh - 1)
        xi = jnp.clip(xc, 0, Wh - 1).astype(jnp.int32)
        yi = jnp.clip(yc, 0, Hh - 1).astype(jnp.int32)
        vals = h_feature[n_idx, :, yi, xi]             # (N, Hl, Wl, C_in)
        vals = jnp.transpose(vals, (0, 3, 1, 2))       # (N, C_in, Hl, Wl)
        return vals * jnp.where(valid, w, 0.0)[:, None, :, :]

    return (tap(x0, y0, wy0 * wx0) + tap(x0 + 1, y0, wy0 * wx1) +
            tap(x0, y0 + 1, wy1 * wx0) + tap(x0 + 1, y0 + 1, wy1 * wx1))


if __name__ == "__main__":
    key = jax.random.PRNGKey(0)
    k1, k2, k3, k4, k5 = jax.random.split(key, 5)
    N, inplane, outplane = 2, 4, 4
    Hl = Wl = 16          # low-level (output) resolution
    Hh = Wh = 8           # high-level feature resolution

    low = jax.random.normal(k1, (N, inplane, Hl, Wl), jnp.float32)
    high = jax.random.normal(k2, (N, inplane, Hh, Wh), jnp.float32)
    w_down_l = jax.random.normal(k3, (outplane, inplane, 1, 1), jnp.float32) * 0.3
    w_down_h = jax.random.normal(k4, (outplane, inplane, 1, 1), jnp.float32) * 0.3
    w_flow = jax.random.normal(k5, (2, 2 * outplane, 3, 3), jnp.float32) * 0.3

    out = jax.block_until_ready(
        aligned_module_forward(low, high, w_down_l, w_down_h, w_flow))
    ref = jax.block_until_ready(
        reference_forward(low, high, w_down_l, w_down_h, w_flow))

    assert out.shape == (N, inplane, Hl, Wl)
    # Tolerance reflects bf16 MXU operands (features / weights / sampling maps) vs the
    # f32 reference; coordinate & accumulation math stays f32 so errors remain O(1e-2).
    if not jnp.allclose(out, ref, atol=6e-2, rtol=6e-2):
        raise AssertionError(
            f"mismatch vs reference, max abs err = {jnp.max(jnp.abs(out - ref))}")
    print("KERNEL_OK")
</pallas_src>

<mosaic_0001>
module attributes {stable_mosaic.version = 11 : i64} {
  func.func @_aligned_kernel(%arg0: i32, %arg1: memref<1x4x512xbf16, #tpu.memory_space<vmem>>, %arg2: memref<1x64x8xbf16, #tpu.memory_space<vmem>>, %arg3: memref<4x4xbf16, #tpu.memory_space<vmem>>, %arg4: memref<4x4xbf16, #tpu.memory_space<vmem>>, %arg5: memref<18x8xbf16, #tpu.memory_space<vmem>>, %arg6: memref<8x512xbf16, #tpu.memory_space<vmem>>, %arg7: memref<8x512xf32, #tpu.memory_space<vmem>>, %arg8: memref<18x512xf32, #tpu.memory_space<vmem>>, %arg9: memref<2x512xf32, #tpu.memory_space<vmem>>, %arg10: memref<1x4x512xf32, #tpu.memory_space<vmem>>, %arg11: memref<8x512xf32, #tpu.memory_space<vmem>>) attributes {dimension_semantics = [#tpu.dimension_semantics<parallel>], iteration_bounds = array<i64: 1>, scalar_prefetch = 0 : i64, scratch_operands = 1 : i64, tpu.core_type = #tpu.core_type<tc>, window_params = [{transform_indices = @transform_0, window_bounds = array<i64: 1, 4, 512>}, {transform_indices = @transform_1, window_bounds = array<i64: 1, 64, 8>}, {pipeline_mode = #tpu.pipeline_mode<synchronous>, transform_indices = @transform_2, window_bounds = array<i64: 4, 4>}, {pipeline_mode = #tpu.pipeline_mode<synchronous>, transform_indices = @transform_3, window_bounds = array<i64: 4, 4>}, {pipeline_mode = #tpu.pipeline_mode<synchronous>, transform_indices = @transform_4, window_bounds = array<i64: 18, 8>}, {pipeline_mode = #tpu.pipeline_mode<synchronous>, transform_indices = @transform_5, window_bounds = array<i64: 8, 512>}, {pipeline_mode = #tpu.pipeline_mode<synchronous>, transform_indices = @transform_6, window_bounds = array<i64: 8, 512>}, {pipeline_mode = #tpu.pipeline_mode<synchronous>, transform_indices = @transform_7, window_bounds = array<i64: 18, 512>}, {pipeline_mode = #tpu.pipeline_mode<synchronous>, transform_indices = @transform_8, window_bounds = array<i64: 2, 512>}, {transform_indices = @transform_9, window_bounds = array<i64: 1, 4, 512>}]} {
    %c0 = arith.constant 0 : index
    %c0_0 = arith.constant 0 : index
    %c0_1 = arith.constant 0 : index
    %0 = vector.load %arg1[%c0, %c0_0, %c0_1] : memref<1x4x512xbf16, #tpu.memory_space<vmem>>, vector<1x4x512xbf16>
    %1 = vector.shape_cast %0 : vector<1x4x512xbf16> to vector<4x512xbf16>
    %c0_2 = arith.constant 0 : index
    %c0_3 = arith.constant 0 : index
    %2 = vector.load %arg3[%c0_2, %c0_3] : memref<4x4xbf16, #tpu.memory_space<vmem>>, vector<4x4xbf16>
    %cst = arith.constant dense<0.000000e+00> : vector<4x512xf32>
    %3 = tpu.matmul %2, %1, %cst {dimension_numbers = #tpu.dot_dimension_numbers<[1], [0], [0], [1], [0, 0, 1, 1], [], []>} : vector<4x4xbf16>, vector<4x512xbf16>, vector<4x512xf32> -> vector<4x512xf32>
    %c4 = arith.constant 4 : index
    %c0_4 = arith.constant 0 : index
    %4 = vector.load %arg11[%c4, %c0_4] : memref<8x512xf32, #tpu.memory_space<vmem>>, vector<4x512xf32>
    tpu.vector_store %arg11[%c4, %c0_4], %3 {strides = array<i32>} : memref<8x512xf32, #tpu.memory_space<vmem>>, vector<4x512xf32>,
    %c0_5 = arith.constant 0 : index
    %c0_6 = arith.constant 0 : index
    %5 = vector.load %arg6[%c0_5, %c0_6] : memref<8x512xbf16, #tpu.memory_space<vmem>>, vector<8x512xbf16>
    %c0_7 = arith.constant 0 : index
    %c0_8 = arith.constant 0 : index
    %6 = vector.load %arg7[%c0_7, %c0_8] : memref<8x512xf32, #tpu.memory_space<vmem>>, vector<8x512xf32>
    %c0_9 = arith.constant 0 : index
    %c0_10 = arith.constant 0 : index
    %c0_11 = arith.constant 0 : index
    %7 = vector.load %arg2[%c0_9, %c0_10, %c0_11] : memref<1x64x8xbf16, #tpu.memory_space<vmem>>, vector<1x32x8xbf16>
    %8 = vector.shape_cast %7 : vector<1x32x8xbf16> to vector<32x8xbf16>
    %9 = vector.extract_strided_slice %5 {offsets = [0, 0], sizes = [8, 256], strides = [1, 1]} : vector<8x512xbf16> to vector<8x256xbf16>
    %cst_12 = arith.constant dense<0.000000e+00> : vector<32x256xf32>
    %10 = tpu.matmul %8, %9, %cst_12 {dimension_numbers = #tpu.dot_dimension_numbers<[1], [0], [0], [1], [0, 0, 1, 1], [], []>} : vector<32x8xbf16>, vector<8x256xbf16>, vector<32x256xf32> -> vector<32x256xf32>
    %11 = vector.extract_strided_slice %6 {offsets = [0, 0], sizes = [8, 256], strides = [1, 1]} : vector<8x512xf32> to vector<8x256xf32>
    %12 = vector.extract_strided_slice %11 {offsets = [0, 0], sizes = [1, 256], strides = [1, 1]} : vector<8x256xf32> to vector<1x256xf32>
    %13 = vector.extract_strided_slice %10 {offsets = [0, 0], sizes = [4, 256], strides = [1, 1]} : vector<32x256xf32> to vector<4x256xf32>
    %14 = vector.broadcast %12 : vector<1x256xf32> to vector<4x256xf32>
    %15 = arith.mulf %14, %13 : vector<4x256xf32>
    %16 = vector.extract_strided_slice %11 {offsets = [1, 0], sizes = [1, 256], strides = [1, 1]} : vector<8x256xf32> to vector<1x256xf32>
    %17 = vector.extract_strided_slice %10 {offsets = [4, 0], sizes = [4, 256], strides = [1, 1]} : vector<32x256xf32> to vector<4x256xf32>
    %18 = vector.broadcast %16 : vector<1x256xf32> to vector<4x256xf32>
    %19 = arith.mulf %18, %17 : vector<4x256xf32>
    %20 = vector.extract_strided_slice %11 {offsets = [2, 0], sizes = [1, 256], strides = [1, 1]} : vector<8x256xf32> to vector<1x256xf32>
    %21 = vector.extract_strided_slice %10 {offsets = [8, 0], sizes = [4, 256], strides = [1, 1]} : vector<32x256xf32> to vector<4x256xf32>
    %22 = vector.broadcast %20 : vector<1x256xf32> to vector<4x256xf32>
    %23 = arith.mulf %22, %21 : vector<4x256xf32>
    %24 = vector.extract_strided_slice %11 {offsets = [3, 0], sizes = [1, 256], strides = [1, 1]} : vector<8x256xf32> to vector<1x256xf32>
    %25 = vector.extract_strided_slice %10 {offsets = [12, 0], sizes = [4, 256], strides = [1, 1]} : vector<32x256xf32> to vector<4x256xf32>
    %26 = vector.broadcast %24 : vector<1x256xf32> to vector<4x256xf32>
    %27 = arith.mulf %26, %25 : vector<4x256xf32>
    %28 = vector.extract_strided_slice %11 {offsets = [4, 0], sizes = [1, 256], strides = [1, 1]} : vector<8x256xf32> to vector<1x256xf32>
    %29 = vector.extract_strided_slice %10 {offsets = [16, 0], sizes = [4, 256], strides = [1, 1]} : vector<32x256xf32> to vector<4x256xf32>
    %30 = vector.broadcast %28 : vector<1x256xf32> to vector<4x256xf32>
    %31 = arith.mulf %30, %29 : vector<4x256xf32>
    %32 = vector.extract_strided_slice %11 {offsets = [5, 0], sizes = [1, 256], strides = [1, 1]} : vector<8x256xf32> to vector<1x256xf32>
    %33 = vector.extract_strided_slice %10 {offsets = [20, 0], sizes = [4, 256], strides = [1, 1]} : vector<32x256xf32> to vector<4x256xf32>
    %34 = vector.broadcast %32 : vector<1x256xf32> to vector<4x256xf32>
    %35 = arith.mulf %34, %33 : vector<4x256xf32>
    %36 = vector.extract_strided_slice %11 {offsets = [6, 0], sizes = [1, 256], strides = [1, 1]} : vector<8x256xf32> to vector<1x256xf32>
    %37 = vector.extract_strided_slice %10 {offsets = [24, 0], sizes = [4, 256], strides = [1, 1]} : vector<32x256xf32> to vector<4x256xf32>
    %38 = vector.broadcast %36 : vector<1x256xf32> to vector<4x256xf32>
    %39 = arith.mulf %38, %37 : vector<4x256xf32>
    %40 = vector.extract_strided_slice %11 {offsets = [7, 0], sizes = [1, 256], strides = [1, 1]} : vector<8x256xf32> to vector<1x256xf32>
    %41 = vector.extract_strided_slice %10 {offsets = [28, 0], sizes = [4, 256], strides = [1, 1]} : vector<32x256xf32> to vector<4x256xf32>
    %42 = vector.broadcast %40 : vector<1x256xf32> to vector<4x256xf32>
    %43 = arith.mulf %42, %41 : vector<4x256xf32>
    %44 = arith.addf %15, %19 : vector<4x256xf32>
    %45 = arith.addf %23, %27 : vector<4x256xf32>
    %46 = arith.addf %31, %35 : vector<4x256xf32>
    %47 = arith.addf %39, %43 : vector<4x256xf32>
    %48 = arith.addf %44, %45 : vector<4x256xf32>
    %49 = arith.addf %46, %47 : vector<4x256xf32>
    %50 = arith.addf %48, %49 : vector<4x256xf32>
    %c0_13 = arith.constant 0 : index
    %c0_14 = arith.constant 0 : index
    %51 = vector.load %arg4[%c0_13, %c0_14] : memref<4x4xbf16, #tpu.memory_space<vmem>>, vector<4x4xbf16>
    %52 = arith.truncf %50 : vector<4x256xf32> to vector<4x256xbf16>
    %cst_15 = arith.constant dense<0.000000e+00> : vector<4x256xf32>
    %53 = tpu.matmul %51, %52, %cst_15 {dimension_numbers = #tpu.dot_dimension_numbers<[1], [0], [0], [1], [0, 0, 1, 1], [], []>} : vector<4x4xbf16>, vector<4x256xbf16>, vector<4x256xf32> -> vector<4x256xf32>
    %c0_16 = arith.constant 0 : index
    %c0_17 = arith.constant 0 : index
    %54 = vector.load %arg11[%c0_16, %c0_17] : memref<8x512xf32, #tpu.memory_space<vmem>>, vector<4x256xf32>
    tpu.vector_store %arg11[%c0_16, %c0_17], %53 {strides = array<i32>} : memref<8x512xf32, #tpu.memory_space<vmem>>, vector<4x256xf32>,
    %c0_18 = arith.constant 0 : index
    %c32 = arith.constant 32 : index
    %c0_19 = arith.constant 0 : index
    %55 = vector.load %arg2[%c0_18, %c32, %c0_19] : memref<1x64x8xbf16, #tpu.memory_space<vmem>>, vector<1x32x8xbf16>
    %56 = vector.shape_cast %55 : vector<1x32x8xbf16> to vector<32x8xbf16>
    %57 = vector.extract_strided_slice %5 {offsets = [0, 256], sizes = [8, 256], strides = [1, 1]} : vector<8x512xbf16> to vector<8x256xbf16>
    %cst_20 = arith.constant dense<0.000000e+00> : vector<32x256xf32>
    %58 = tpu.matmul %56, %57, %cst_20 {dimension_numbers = #tpu.dot_dimension_numbers<[1], [0], [0], [1], [0, 0, 1, 1], [], []>} : vector<32x8xbf16>, vector<8x256xbf16>, vector<32x256xf32> -> vector<32x256xf32>
    %59 = vector.extract_strided_slice %6 {offsets = [0, 256], sizes = [8, 256], strides = [1, 1]} : vector<8x512xf32> to vector<8x256xf32>
    %60 = vector.extract_strided_slice %59 {offsets = [0, 0], sizes = [1, 256], strides = [1, 1]} : vector<8x256xf32> to vector<1x256xf32>
    %61 = vector.extract_strided_slice %58 {offsets = [0, 0], sizes = [4, 256], strides = [1, 1]} : vector<32x256xf32> to vector<4x256xf32>
    %62 = vector.broadcast %60 : vector<1x256xf32> to vector<4x256xf32>
    %63 = arith.mulf %62, %61 : vector<4x256xf32>
    %64 = vector.extract_strided_slice %59 {offsets = [1, 0], sizes = [1, 256], strides = [1, 1]} : vector<8x256xf32> to vector<1x256xf32>
    %65 = vector.extract_strided_slice %58 {offsets = [4, 0], sizes = [4, 256], strides = [1, 1]} : vector<32x256xf32> to vector<4x256xf32>
    %66 = vector.broadcast %64 : vector<1x256xf32> to vector<4x256xf32>
    %67 = arith.mulf %66, %65 : vector<4x256xf32>
    %68 = vector.extract_strided_slice %59 {offsets = [2, 0], sizes = [1, 256], strides = [1, 1]} : vector<8x256xf32> to vector<1x256xf32>
    %69 = vector.extract_strided_slice %58 {offsets = [8, 0], sizes = [4, 256], strides = [1, 1]} : vector<32x256xf32> to vector<4x256xf32>
    %70 = vector.broadcast %68 : vector<1x256xf32> to vector<4x256xf32>
    %71 = arith.mulf %70, %69 : vector<4x256xf32>
    %72 = vector.extract_strided_slice %59 {offsets = [3, 0], sizes = [1, 256], strides = [1, 1]} : vector<8x256xf32> to vector<1x256xf32>
    %73 = vector.extract_strided_slice %58 {offsets = [12, 0], sizes = [4, 256], strides = [1, 1]} : vector<32x256xf32> to vector<4x256xf32>
    %74 = vector.broadcast %72 : vector<1x256xf32> to vector<4x256xf32>
    %75 = arith.mulf %74, %73 : vector<4x256xf32>
    %76 = vector.extract_strided_slice %59 {offsets = [4, 0], sizes = [1, 256], strides = [1, 1]} : vector<8x256xf32> to vector<1x256xf32>
    %77 = vector.extract_strided_slice %58 {offsets = [16, 0], sizes = [4, 256], strides = [1, 1]} : vector<32x256xf32> to vector<4x256xf32>
    %78 = vector.broadcast %76 : vector<1x256xf32> to vector<4x256xf32>
    %79 = arith.mulf %78, %77 : vector<4x256xf32>
    %80 = vector.extract_strided_slice %59 {offsets = [5, 0], sizes = [1, 256], strides = [1, 1]} : vector<8x256xf32> to vector<1x256xf32>
    %81 = vector.extract_strided_slice %58 {offsets = [20, 0], sizes = [4, 256], strides = [1, 1]} : vector<32x256xf32> to vector<4x256xf32>
    %82 = vector.broadcast %80 : vector<1x256xf32> to vector<4x256xf32>
    %83 = arith.mulf %82, %81 : vector<4x256xf32>
    %84 = vector.extract_strided_slice %59 {offsets = [6, 0], sizes = [1, 256], strides = [1, 1]} : vector<8x256xf32> to vector<1x256xf32>
    %85 = vector.extract_strided_slice %58 {offsets = [24, 0], sizes = [4, 256], strides = [1, 1]} : vector<32x256xf32> to vector<4x256xf32>
    %86 = vector.broadcast %84 : vector<1x256xf32> to vector<4x256xf32>
    %87 = arith.mulf %86, %85 : vector<4x256xf32>
    %88 = vector.extract_strided_slice %59 {offsets = [7, 0], sizes = [1, 256], strides = [1, 1]} : vector<8x256xf32> to vector<1x256xf32>
    %89 = vector.extract_strided_slice %58 {offsets = [28, 0], sizes = [4, 256], strides = [1, 1]} : vector<32x256xf32> to vector<4x256xf32>
    %90 = vector.broadcast %88 : vector<1x256xf32> to vector<4x256xf32>
    %91 = arith.mulf %90, %89 : vector<4x256xf32>
    %92 = arith.addf %63, %67 : vector<4x256xf32>
    %93 = arith.addf %71, %75 : vector<4x256xf32>
    %94 = arith.addf %79, %83 : vector<4x256xf32>
    %95 = arith.addf %87, %91 : vector<4x256xf32>
    %96 = arith.addf %92, %93 : vector<4x256xf32>
    %97 = arith.addf %94, %95 : vector<4x256xf32>
    %98 = arith.addf %96, %97 : vector<4x256xf32>
    %c0_21 = arith.constant 0 : index
    %c0_22 = arith.constant 0 : index
    %99 = vector.load %arg4[%c0_21, %c0_22] : memref<4x4xbf16, #tpu.memory_space<vmem>>, vector<4x4xbf16>
    %100 = arith.truncf %98 : vector<4x256xf32> to vector<4x256xbf16>
    %cst_23 = arith.constant dense<0.000000e+00> : vector<4x256xf32>
    %101 = tpu.matmul %99, %100, %cst_23 {dimension_numbers = #tpu.dot_dimension_numbers<[1], [0], [0], [1], [0, 0, 1, 1], [], []>} : vector<4x4xbf16>, vector<4x256xbf16>, vector<4x256xf32> -> vector<4x256xf32>
    %c0_24 = arith.constant 0 : index
    %c256 = arith.constant 256 : index
    %102 = vector.load %arg11[%c0_24, %c256] : memref<8x512xf32, #tpu.memory_space<vmem>>, vector<4x256xf32>
    tpu.vector_store %arg11[%c0_24, %c256], %101 {strides = array<i32>} : memref<8x512xf32, #tpu.memory_space<vmem>>, vector<4x256xf32>,
    %c0_25 = arith.constant 0 : index
    %c0_26 = arith.constant 0 : index
    %103 = vector.load %arg5[%c0_25, %c0_26] : memref<18x8xbf16, #tpu.memory_space<vmem>>, vector<18x8xbf16>
    %c0_27 = arith.constant 0 : index
    %c0_28 = arith.constant 0 : index
    %104 = vector.load %arg11[%c0_27, %c0_28] : memref<8x512xf32, #tpu.memory_space<vmem>>, vector<8x512xf32>
    %105 = arith.truncf %104 : vector<8x512xf32> to vector<8x512xbf16>
    %cst_29 = arith.constant dense<0.000000e+00> : vector<18x512xf32>
    %106 = tpu.matmul %103, %105, %cst_29 {dimension_numbers = #tpu.dot_dimension_numbers<[1], [0], [0], [1], [0, 0, 1, 1], [], []>} : vector<18x8xbf16>, vector<8x512xbf16>, vector<18x512xf32> -> vector<18x512xf32>
    %c0_30 = arith.constant 0 : index
    %c0_31 = arith.constant 0 : index
    %107 = vector.load %arg8[%c0_30, %c0_31] : memref<18x512xf32, #tpu.memory_space<vmem>>, vector<18x512xf32>
    %108 = arith.mulf %106, %107 : vector<18x512xf32>
    %109 = vector.extract_strided_slice %108 {offsets = [0, 0], sizes = [2, 512], strides = [1, 1]} : vector<18x512xf32> to vector<2x512xf32>
    %c17_i32 = arith.constant 17 : i32
    %110 = tpu.dynamic_rotate %109 by %c17_i32 dim 1 : vector<2x512xf32>, i32 -> vector<2x512xf32>
    %111 = vector.extract_strided_slice %108 {offsets = [2, 0], sizes = [2, 512], strides = [1, 1]} : vector<18x512xf32> to vector<2x512xf32>
    %c16_i32 = arith.constant 16 : i32
    %112 = tpu.dynamic_rotate %111 by %c16_i32 dim 1 : vector<2x512xf32>, i32 -> vector<2x512xf32>
    %113 = vector.extract_strided_slice %108 {offsets = [4, 0], sizes = [2, 512], strides = [1, 1]} : vector<18x512xf32> to vector<2x512xf32>
    %c15_i32 = arith.constant 15 : i32
    %114 = tpu.dynamic_rotate %113 by %c15_i32 dim 1 : vector<2x512xf32>, i32 -> vector<2x512xf32>
    %115 = vector.extract_strided_slice %108 {offsets = [6, 0], sizes = [2, 512], strides = [1, 1]} : vector<18x512xf32> to vector<2x512xf32>
    %c1_i32 = arith.constant 1 : i32
    %116 = tpu.dynamic_rotate %115 by %c1_i32 dim 1 : vector<2x512xf32>, i32 -> vector<2x512xf32>
    %117 = vector.extract_strided_slice %108 {offsets = [8, 0], sizes = [2, 512], strides = [1, 1]} : vector<18x512xf32> to vector<2x512xf32>
    %118 = vector.extract_strided_slice %108 {offsets = [10, 0], sizes = [2, 512], strides = [1, 1]} : vector<18x512xf32> to vector<2x512xf32>
    %c511_i32 = arith.constant 511 : i32
    %119 = tpu.dynamic_rotate %118 by %c511_i32 dim 1 : vector<2x512xf32>, i32 -> vector<2x512xf32>
    %120 = vector.extract_strided_slice %108 {offsets = [12, 0], sizes = [2, 512], strides = [1, 1]} : vector<18x512xf32> to vector<2x512xf32>
    %c497_i32 = arith.constant 497 : i32
    %121 = tpu.dynamic_rotate %120 by %c497_i32 dim 1 : vector<2x512xf32>, i32 -> vector<2x512xf32>
    %122 = vector.extract_strided_slice %108 {offsets = [14, 0], sizes = [2, 512], strides = [1, 1]} : vector<18x512xf32> to vector<2x512xf32>
    %c496_i32 = arith.constant 496 : i32
    %123 = tpu.dynamic_rotate %122 by %c496_i32 dim 1 : vector<2x512xf32>, i32 -> vector<2x512xf32>
    %124 = vector.extract_strided_slice %108 {offsets = [16, 0], sizes = [2, 512], strides = [1, 1]} : vector<18x512xf32> to vector<2x512xf32>
    %c495_i32 = arith.constant 495 : i32
    %125 = tpu.dynamic_rotate %124 by %c495_i32 dim 1 : vector<2x512xf32>, i32 -> vector<2x512xf32>
    %126 = arith.addf %110, %112 : vector<2x512xf32>
    %127 = arith.addf %114, %116 : vector<2x512xf32>
    %128 = arith.addf %117, %119 : vector<2x512xf32>
    %129 = arith.addf %121, %123 : vector<2x512xf32>
    %130 = arith.addf %126, %127 : vector<2x512xf32>
    %131 = arith.addf %128, %129 : vector<2x512xf32>
    %132 = arith.addf %130, %131 : vector<2x512xf32>
    %133 = arith.addf %132, %125 : vector<2x512xf32>
    %c0_32 = arith.constant 0 : index
    %c0_33 = arith.constant 0 : index
    %134 = vector.load %arg9[%c0_32, %c0_33] : memref<2x512xf32, #tpu.memory_space<vmem>>, vector<2x512xf32>
    %135 = arith.addf %134, %133 : vector<2x512xf32>
    %136 = math.floor %135 : vector<2x512xf32>
    %137 = arith.subf %135, %136 : vector<2x512xf32>
    %cst_34 = arith.constant 1.000000e+00 : f32
    %138 = vector.broadcast %cst_34 : f32 to vector<2x512xf32>
    %139 = arith.subf %138, %137 : vector<2x512xf32>
    %140 = vector.extract_strided_slice %136 {offsets = [0, 0], sizes = [1, 512], strides = [1, 1]} : vector<2x512xf32> to vector<1x512xf32>
    %141 = vector.extract_strided_slice %136 {offsets = [1, 0], sizes = [1, 512], strides = [1, 1]} : vector<2x512xf32> to vector<1x512xf32>
    %cst_35 = arith.constant 1.000000e+00 : f32
    %142 = vector.broadcast %cst_35 : f32 to vector<1x512xf32>
    %143 = arith.addf %140, %142 : vector<1x512xf32>
    %cst_36 = arith.constant 1.000000e+00 : f32
    %144 = vector.broadcast %cst_36 : f32 to vector<1x512xf32>
    %145 = arith.addf %141, %144 : vector<1x512xf32>
    %cst_37 = arith.constant 0.000000e+00 : f32
    %146 = vector.broadcast %cst_37 : f32 to vector<1x512xf32>
    %147 = arith.cmpf oge, %140, %146 : vector<1x512xf32>
    %cst_38 = arith.constant 7.000000e+00 : f32
    %148 = vector.broadcast %cst_38 : f32 to vector<1x512xf32>
    %149 = arith.cmpf ole, %140, %148 : vector<1x512xf32>
    %150 = arith.andi %147, %149 : vector<1x512xi1>
    %151 = vector.extract_strided_slice %139 {offsets = [0, 0], sizes = [1, 512], strides = [1, 1]} : vector<2x512xf32> to vector<1x512xf32>
    %cst_39 = arith.constant 0.000000e+00 : f32
    %152 = vector.broadcast %cst_39 : f32 to vector<1x512xf32>
    %153 = arith.select %150, %151, %152 : vector<1x512xi1>, vector<1x512xf32>
    %cst_40 = arith.constant 0.000000e+00 : f32
    %154 = vector.broadcast %cst_40 : f32 to vector<1x512xf32>
    %155 = arith.cmpf oge, %143, %154 : vector<1x512xf32>
    %cst_41 = arith.constant 7.000000e+00 : f32
    %156 = vector.broadcast %cst_41 : f32 to vector<1x512xf32>
    %157 = arith.cmpf ole, %143, %156 : vector<1x512xf32>
    %158 = arith.andi %155, %157 : vector<1x512xi1>
    %159 = vector.extract_strided_slice %137 {offsets = [0, 0], sizes = [1, 512], strides = [1, 1]} : vector<2x512xf32> to vector<1x512xf32>
    %cst_42 = arith.constant 0.000000e+00 : f32
    %160 = vector.broadcast %cst_42 : f32 to vector<1x512xf32>
    %161 = arith.select %158, %159, %160 : vector<1x512xi1>, vector<1x512xf32>
    %cst_43 = arith.constant 0.000000e+00 : f32
    %162 = vector.broadcast %cst_43 : f32 to vector<1x512xf32>
    %163 = arith.cmpf oge, %141, %162 : vector<1x512xf32>
    %cst_44 = arith.constant 7.000000e+00 : f32
    %164 = vector.broadcast %cst_44 : f32 to vector<1x512xf32>
    %165 = arith.cmpf ole, %141, %164 : vector<1x512xf32>
    %166 = arith.andi %163, %165 : vector<1x512xi1>
    %167 = vector.extract_strided_slice %139 {offsets = [1, 0], sizes = [1, 512], strides = [1, 1]} : vector<2x512xf32> to vector<1x512xf32>
    %cst_45 = arith.constant 0.000000e+00 : f32
    %168 = vector.broadcast %cst_45 : f32 to vector<1x512xf32>
    %169 = arith.select %166, %167, %168 : vector<1x512xi1>, vector<1x512xf32>
    %cst_46 = arith.constant 0.000000e+00 : f32
    %170 = vector.broadcast %cst_46 : f32 to vector<1x512xf32>
    %171 = arith.cmpf oge, %145, %170 : vector<1x512xf32>
    %cst_47 = arith.constant 7.000000e+00 : f32
    %172 = vector.broadcast %cst_47 : f32 to vector<1x512xf32>
    %173 = arith.cmpf ole, %145, %172 : vector<1x512xf32>
    %174 = arith.andi %171, %173 : vector<1x512xi1>
    %175 = vector.extract_strided_slice %137 {offsets = [1, 0], sizes = [1, 512], strides = [1, 1]} : vector<2x512xf32> to vector<1x512xf32>
    %cst_48 = arith.constant 0.000000e+00 : f32
    %176 = vector.broadcast %cst_48 : f32 to vector<1x512xf32>
    %177 = arith.select %174, %175, %176 : vector<1x512xi1>, vector<1x512xf32>
    %cst_49 = arith.constant 0.000000e+00 : f32
    %cst_50 = arith.constant 7.000000e+00 : f32
    %178 = vector.broadcast %cst_49 : f32 to vector<1x512xf32>
    %179 = arith.maximumf %178, %140 : vector<1x512xf32>
    %180 = vector.broadcast %cst_50 : f32 to vector<1x512xf32>
    %181 = arith.minimumf %180, %179 : vector<1x512xf32>
    %182 = arith.fptosi %181 : vector<1x512xf32> to vector<1x512xi32>
    %cst_51 = arith.constant 0.000000e+00 : f32
    %cst_52 = arith.constant 7.000000e+00 : f32
    %183 = vector.broadcast %cst_51 : f32 to vector<1x512xf32>
    %184 = arith.maximumf %183, %143 : vector<1x512xf32>
    %185 = vector.broadcast %cst_52 : f32 to vector<1x512xf32>
    %186 = arith.minimumf %185, %184 : vector<1x512xf32>
    %187 = arith.fptosi %186 : vector<1x512xf32> to vector<1x512xi32>
    %cst_53 = arith.constant 0.000000e+00 : f32
    %cst_54 = arith.constant 7.000000e+00 : f32
    %188 = vector.broadcast %cst_53 : f32 to vector<1x512xf32>
    %189 = arith.maximumf %188, %141 : vector<1x512xf32>
    %190 = vector.broadcast %cst_54 : f32 to vector<1x512xf32>
    %191 = arith.minimumf %190, %189 : vector<1x512xf32>
    %192 = arith.fptosi %191 : vector<1x512xf32> to vector<1x512xi32>
    %cst_55 = arith.constant 0.000000e+00 : f32
    %cst_56 = arith.constant 7.000000e+00 : f32
    %193 = vector.broadcast %cst_55 : f32 to vector<1x512xf32>
    %194 = arith.maximumf %193, %145 : vector<1x512xf32>
    %195 = vector.broadcast %cst_56 : f32 to vector<1x512xf32>
    %196 = arith.minimumf %195, %194 : vector<1x512xf32>
    %197 = arith.fptosi %196 : vector<1x512xf32> to vector<1x512xi32>
    %198 = tpu.iota {dimensions = array<i32: 0>} : vector<8x512xi32>
    %199 = tpu.iota {dimensions = array<i32: 0>} : vector<8x512xi32>
    %200 = vector.broadcast %182 : vector<1x512xi32> to vector<8x512xi32>
    %201 = arith.cmpi eq, %198, %200 : vector<8x512xi32>
    %cst_57 = arith.constant 0.000000e+00 : f32
    %202 = vector.shape_cast %153 : vector<1x512xf32> to vector<1x512xf32>
    %203 = vector.broadcast %202 : vector<1x512xf32> to vector<8x512xf32>
    %204 = vector.broadcast %cst_57 : f32 to vector<8x512xf32>
    %205 = arith.select %201, %203, %204 : vector<8x512xi1>, vector<8x512xf32>
    %206 = vector.broadcast %187 : vector<1x512xi32> to vector<8x512xi32>
    %207 = arith.cmpi eq, %198, %206 : vector<8x512xi32>
    %cst_58 = arith.constant 0.000000e+00 : f32
    %208 = vector.shape_cast %161 : vector<1x512xf32> to vector<1x512xf32>
    %209 = vector.broadcast %208 : vector<1x512xf32> to vector<8x512xf32>
    %210 = vector.broadcast %cst_58 : f32 to vector<8x512xf32>
    %211 = arith.select %207, %209, %210 : vector<8x512xi1>, vector<8x512xf32>
    %212 = arith.addf %205, %211 : vector<8x512xf32>
    %213 = arith.truncf %212 : vector<8x512xf32> to vector<8x512xbf16>
    %214 = vector.broadcast %192 : vector<1x512xi32> to vector<8x512xi32>
    %215 = arith.cmpi eq, %199, %214 : vector<8x512xi32>
    %cst_59 = arith.constant 0.000000e+00 : f32
    %216 = vector.shape_cast %169 : vector<1x512xf32> to vector<1x512xf32>
    %217 = vector.broadcast %216 : vector<1x512xf32> to vector<8x512xf32>
    %218 = vector.broadcast %cst_59 : f32 to vector<8x512xf32>
    %219 = arith.select %215, %217, %218 : vector<8x512xi1>, vector<8x512xf32>
    %220 = vector.broadcast %197 : vector<1x512xi32> to vector<8x512xi32>
    %221 = arith.cmpi eq, %199, %220 : vector<8x512xi32>
    %cst_60 = arith.constant 0.000000e+00 : f32
    %222 = vector.shape_cast %177 : vector<1x512xf32> to vector<1x512xf32>
    %223 = vector.broadcast %222 : vector<1x512xf32> to vector<8x512xf32>
    %224 = vector.broadcast %cst_60 : f32 to vector<8x512xf32>
    %225 = arith.select %221, %223, %224 : vector<8x512xi1>, vector<8x512xf32>
    %226 = arith.addf %219, %225 : vector<8x512xf32>
    %c0_61 = arith.constant 0 : index
    %c0_62 = arith.constant 0 : index
    %c0_63 = arith.constant 0 : index
    %227 = vector.load %arg2[%c0_61, %c0_62, %c0_63] : memref<1x64x8xbf16, #tpu.memory_space<vmem>>, vector<1x32x8xbf16>
    %228 = vector.shape_cast %227 : vector<1x32x8xbf16> to vector<32x8xbf16>
    %229 = vector.extract_strided_slice %213 {offsets = [0, 0], sizes = [8, 256], strides = [1, 1]} : vector<8x512xbf16> to vector<8x256xbf16>
    %cst_64 = arith.constant dense<0.000000e+00> : vector<32x256xf32>
    %230 = tpu.matmul %228, %229, %cst_64 {dimension_numbers = #tpu.dot_dimension_numbers<[1], [0], [0], [1], [0, 0, 1, 1], [], []>} : vector<32x8xbf16>, vector<8x256xbf16>, vector<32x256xf32> -> vector<32x256xf32>
    %231 = vector.extract_strided_slice %226 {offsets = [0, 0], sizes = [8, 256], strides = [1, 1]} : vector<8x512xf32> to vector<8x256xf32>
    %232 = vector.extract_strided_slice %231 {offsets = [0, 0], sizes = [1, 256], strides = [1, 1]} : vector<8x256xf32> to vector<1x256xf32>
    %233 = vector.extract_strided_slice %230 {offsets = [0, 0], sizes = [4, 256], strides = [1, 1]} : vector<32x256xf32> to vector<4x256xf32>
    %234 = vector.broadcast %232 : vector<1x256xf32> to vector<4x256xf32>
    %235 = arith.mulf %234, %233 : vector<4x256xf32>
    %236 = vector.extract_strided_slice %231 {offsets = [1, 0], sizes = [1, 256], strides = [1, 1]} : vector<8x256xf32> to vector<1x256xf32>
    %237 = vector.extract_strided_slice %230 {offsets = [4, 0], sizes = [4, 256], strides = [1, 1]} : vector<32x256xf32> to vector<4x256xf32>
    %238 = vector.broadcast %236 : vector<1x256xf32> to vector<4x256xf32>
    %239 = arith.mulf %238, %237 : vector<4x256xf32>
    %240 = vector.extract_strided_slice %231 {offsets = [2, 0], sizes = [1, 256], strides = [1, 1]} : vector<8x256xf32> to vector<1x256xf32>
    %241 = vector.extract_strided_slice %230 {offsets = [8, 0], sizes = [4, 256], strides = [1, 1]} : vector<32x256xf32> to vector<4x256xf32>
    %242 = vector.broadcast %240 : vector<1x256xf32> to vector<4x256xf32>
    %243 = arith.mulf %242, %241 : vector<4x256xf32>
    %244 = vector.extract_strided_slice %231 {offsets = [3, 0], sizes = [1, 256], strides = [1, 1]} : vector<8x256xf32> to vector<1x256xf32>
    %245 = vector.extract_strided_slice %230 {offsets = [12, 0], sizes = [4, 256], strides = [1, 1]} : vector<32x256xf32> to vector<4x256xf32>
    %246 = vector.broadcast %244 : vector<1x256xf32> to vector<4x256xf32>
    %247 = arith.mulf %246, %245 : vector<4x256xf32>
    %248 = vector.extract_strided_slice %231 {offsets = [4, 0], sizes = [1, 256], strides = [1, 1]} : vector<8x256xf32> to vector<1x256xf32>
    %249 = vector.extract_strided_slice %230 {offsets = [16, 0], sizes = [4, 256], strides = [1, 1]} : vector<32x256xf32> to vector<4x256xf32>
    %250 = vector.broadcast %248 : vector<1x256xf32> to vector<4x256xf32>
    %251 = arith.mulf %250, %249 : vector<4x256xf32>
    %252 = vector.extract_strided_slice %231 {offsets = [5, 0], sizes = [1, 256], strides = [1, 1]} : vector<8x256xf32> to vector<1x256xf32>
    %253 = vector.extract_strided_slice %230 {offsets = [20, 0], sizes = [4, 256], strides = [1, 1]} : vector<32x256xf32> to vector<4x256xf32>
    %254 = vector.broadcast %252 : vector<1x256xf32> to vector<4x256xf32>
    %255 = arith.mulf %254, %253 : vector<4x256xf32>
    %256 = vector.extract_strided_slice %231 {offsets = [6, 0], sizes = [1, 256], strides = [1, 1]} : vector<8x256xf32> to vector<1x256xf32>
    %257 = vector.extract_strided_slice %230 {offsets = [24, 0], sizes = [4, 256], strides = [1, 1]} : vector<32x256xf32> to vector<4x256xf32>
    %258 = vector.broadcast %256 : vector<1x256xf32> to vector<4x256xf32>
    %259 = arith.mulf %258, %257 : vector<4x256xf32>
    %260 = vector.extract_strided_slice %231 {offsets = [7, 0], sizes = [1, 256], strides = [1, 1]} : vector<8x256xf32> to vector<1x256xf32>
    %261 = vector.extract_strided_slice %230 {offsets = [28, 0], sizes = [4, 256], strides = [1, 1]} : vector<32x256xf32> to vector<4x256xf32>
    %262 = vector.broadcast %260 : vector<1x256xf32> to vector<4x256xf32>
    %263 = arith.mulf %262, %261 : vector<4x256xf32>
    %264 = arith.addf %235, %239 : vector<4x256xf32>
    %265 = arith.addf %243, %247 : vector<4x256xf32>
    %266 = arith.addf %251, %255 : vector<4x256xf32>
    %267 = arith.addf %259, %263 : vector<4x256xf32>
    %268 = arith.addf %264, %265 : vector<4x256xf32>
    %269 = arith.addf %266, %267 : vector<4x256xf32>
    %270 = arith.addf %268, %269 : vector<4x256xf32>
    %c0_65 = arith.constant 0 : index
    %c0_66 = arith.constant 0 : index
    %c0_67 = arith.constant 0 : index
    %271 = vector.load %arg10[%c0_65, %c0_66, %c0_67] : memref<1x4x512xf32, #tpu.memory_space<vmem>>, vector<1x4x256xf32>
    %272 = vector.shape_cast %271 : vector<1x4x256xf32> to vector<4x256xf32>
    %273 = vector.shape_cast %270 : vector<4x256xf32> to vector<1x4x256xf32>
    tpu.vector_store %arg10[%c0_65, %c0_66, %c0_67], %273 {strides = array<i32>} : memref<1x4x512xf32, #tpu.memory_space<vmem>>, vector<1x4x256xf32>,
    %c0_68 = arith.constant 0 : index
    %c32_69 = arith.constant 32 : index
    %c0_70 = arith.constant 0 : index
    %274 = vector.load %arg2[%c0_68, %c32_69, %c0_70] : memref<1x64x8xbf16, #tpu.memory_space<vmem>>, vector<1x32x8xbf16>
    %275 = vector.shape_cast %274 : vector<1x32x8xbf16> to vector<32x8xbf16>
    %276 = vector.extract_strided_slice %213 {offsets = [0, 256], sizes = [8, 256], strides = [1, 1]} : vector<8x512xbf16> to vector<8x256xbf16>
    %cst_71 = arith.constant dense<0.000000e+00> : vector<32x256xf32>
    %277 = tpu.matmul %275, %276, %cst_71 {dimension_numbers = #tpu.dot_dimension_numbers<[1], [0], [0], [1], [0, 0, 1, 1], [], []>} : vector<32x8xbf16>, vector<8x256xbf16>, vector<32x256xf32> -> vector<32x256xf32>
    %278 = vector.extract_strided_slice %226 {offsets = [0, 256], sizes = [8, 256], strides = [1, 1]} : vector<8x512xf32> to vector<8x256xf32>
    %279 = vector.extract_strided_slice %278 {offsets = [0, 0], sizes = [1, 256], strides = [1, 1]} : vector<8x256xf32> to vector<1x256xf32>
    %280 = vector.extract_strided_slice %277 {offsets = [0, 0], sizes = [4, 256], strides = [1, 1]} : vector<32x256xf32> to vector<4x256xf32>
    %281 = vector.broadcast %279 : vector<1x256xf32> to vector<4x256xf32>
    %282 = arith.mulf %281, %280 : vector<4x256xf32>
    %283 = vector.extract_strided_slice %278 {offsets = [1, 0], sizes = [1, 256], strides = [1, 1]} : vector<8x256xf32> to vector<1x256xf32>
    %284 = vector.extract_strided_slice %277 {offsets = [4, 0], sizes = [4, 256], strides = [1, 1]} : vector<32x256xf32> to vector<4x256xf32>
    %285 = vector.broadcast %283 : vector<1x256xf32> to vector<4x256xf32>
    %286 = arith.mulf %285, %284 : vector<4x256xf32>
    %287 = vector.extract_strided_slice %278 {offsets = [2, 0], sizes = [1, 256], strides = [1, 1]} : vector<8x256xf32> to vector<1x256xf32>
    %288 = vector.extract_strided_slice %277 {offsets = [8, 0], sizes = [4, 256], strides = [1, 1]} : vector<32x256xf32> to vector<4x256xf32>
    %289 = vector.broadcast %287 : vector<1x256xf32> to vector<4x256xf32>
    %290 = arith.mulf %289, %288 : vector<4x256xf32>
    %291 = vector.extract_strided_slice %278 {offsets = [3, 0], sizes = [1, 256], strides = [1, 1]} : vector<8x256xf32> to vector<1x256xf32>
    %292 = vector.extract_strided_slice %277 {offsets = [12, 0], sizes = [4, 256], strides = [1, 1]} : vector<32x256xf32> to vector<4x256xf32>
    %293 = vector.broadcast %291 : vector<1x256xf32> to vector<4x256xf32>
    %294 = arith.mulf %293, %292 : vector<4x256xf32>
    %295 = vector.extract_strided_slice %278 {offsets = [4, 0], sizes = [1, 256], strides = [1, 1]} : vector<8x256xf32> to vector<1x256xf32>
    %296 = vector.extract_strided_slice %277 {offsets = [16, 0], sizes = [4, 256], strides = [1, 1]} : vector<32x256xf32> to vector<4x256xf32>
    %297 = vector.broadcast %295 : vector<1x256xf32> to vector<4x256xf32>
    %298 = arith.mulf %297, %296 : vector<4x256xf32>
    %299 = vector.extract_strided_slice %278 {offsets = [5, 0], sizes = [1, 256], strides = [1, 1]} : vector<8x256xf32> to vector<1x256xf32>
    %300 = vector.extract_strided_slice %277 {offsets = [20, 0], sizes = [4, 256], strides = [1, 1]} : vector<32x256xf32> to vector<4x256xf32>
    %301 = vector.broadcast %299 : vector<1x256xf32> to vector<4x256xf32>
    %302 = arith.mulf %301, %300 : vector<4x256xf32>
    %303 = vector.extract_strided_slice %278 {offsets = [6, 0], sizes = [1, 256], strides = [1, 1]} : vector<8x256xf32> to vector<1x256xf32>
    %304 = vector.extract_strided_slice %277 {offsets = [24, 0], sizes = [4, 256], strides = [1, 1]} : vector<32x256xf32> to vector<4x256xf32>
    %305 = vector.broadcast %303 : vector<1x256xf32> to vector<4x256xf32>
    %306 = arith.mulf %305, %304 : vector<4x256xf32>
    %307 = vector.extract_strided_slice %278 {offsets = [7, 0], sizes = [1, 256], strides = [1, 1]} : vector<8x256xf32> to vector<1x256xf32>
    %308 = vector.extract_strided_slice %277 {offsets = [28, 0], sizes = [4, 256], strides = [1, 1]} : vector<32x256xf32> to vector<4x256xf32>
    %309 = vector.broadcast %307 : vector<1x256xf32> to vector<4x256xf32>
    %310 = arith.mulf %309, %308 : vector<4x256xf32>
    %311 = arith.addf %282, %286 : vector<4x256xf32>
    %312 = arith.addf %290, %294 : vector<4x256xf32>
    %313 = arith.addf %298, %302 : vector<4x256xf32>
    %314 = arith.addf %306, %310 : vector<4x256xf32>
    %315 = arith.addf %311, %312 : vector<4x256xf32>
    %316 = arith.addf %313, %314 : vector<4x256xf32>
    %317 = arith.addf %315, %316 : vector<4x256xf32>
    %c0_72 = arith.constant 0 : index
    %c0_73 = arith.constant 0 : index
    %c256_74 = arith.constant 256 : index
    %318 = vector.load %arg10[%c0_72, %c0_73, %c256_74] : memref<1x4x512xf32, #tpu.memory_space<vmem>>, vector<1x4x256xf32>
    %319 = vector.shape_cast %318 : vector<1x4x256xf32> to vector<4x256xf32>
    %320 = vector.shape_cast %317 : vector<4x256xf32> to vector<1x4x256xf32>
    tpu.vector_store %arg10[%c0_72, %c0_73, %c256_74], %320 {strides = array<i32>} : memref<1x4x512xf32, #tpu.memory_space<vmem>>, vector<1x4x256xf32>,
    return
  }
  func.func @transform_0(%arg0: i32) -> (i32, i32, i32) {
    %c0_i32 = arith.constant 0 : i32
    %c0_i32_0 = arith.constant 0 : i32
    %c0_i32_1 = arith.constant 0 : i32
    return %arg0, %c0_i32, %c0_i32_0 : i32, i32, i32
  }
  func.func @transform_1(%arg0: i32) -> (i32, i32, i32) {
    %c0_i32 = arith.constant 0 : i32
    %c0_i32_0 = arith.constant 0 : i32
    %c0_i32_1 = arith.constant 0 : i32
    return %arg0, %c0_i32, %c0_i32_0 : i32, i32, i32
  }
  func.func @transform_2(%arg0: i32) -> (i32, i32) {
    %c0_i32 = arith.constant 0 : i32
    %c0_i32_0 = arith.constant 0 : i32
    %c0_i32_1 = arith.constant 0 : i32
    return %c0_i32, %c0_i32_0 : i32, i32
  }
  func.func @transform_3(%arg0: i32) -> (i32, i32) {
    %c0_i32 = arith.constant 0 : i32
    %c0_i32_0 = arith.constant 0 : i32
    %c0_i32_1 = arith.constant 0 : i32
    return %c0_i32, %c0_i32_0 : i32, i32
  }
  func.func @transform_4(%arg0: i32) -> (i32, i32) {
    %c0_i32 = arith.constant 0 : i32
    %c0_i32_0 = arith.constant 0 : i32
    %c0_i32_1 = arith.constant 0 : i32
    return %c0_i32, %c0_i32_0 : i32, i32
  }
  func.func @transform_5(%arg0: i32) -> (i32, i32) {
    %c0_i32 = arith.constant 0 : i32
    %c0_i32_0 = arith.constant 0 : i32
    %c0_i32_1 = arith.constant 0 : i32
    return %c0_i32, %c0_i32_0 : i32, i32
  }
  func.func @transform_6(%arg0: i32) -> (i32, i32) {
    %c0_i32 = arith.constant 0 : i32
    %c0_i32_0 = arith.constant 0 : i32
    %c0_i32_1 = arith.constant 0 : i32
    return %c0_i32, %c0_i32_0 : i32, i32
  }
  func.func @transform_7(%arg0: i32) -> (i32, i32) {
    %c0_i32 = arith.constant 0 : i32
    %c0_i32_0 = arith.constant 0 : i32
    %c0_i32_1 = arith.constant 0 : i32
    return %c0_i32, %c0_i32_0 : i32, i32
  }
  func.func @transform_8(%arg0: i32) -> (i32, i32) {
    %c0_i32 = arith.constant 0 : i32
    %c0_i32_0 = arith.constant 0 : i32
    %c0_i32_1 = arith.constant 0 : i32
    return %c0_i32, %c0_i32_0 : i32, i32
  }
  func.func @transform_9(%arg0: i32) -> (i32, i32, i32) {
    %c0_i32 = arith.constant 0 : i32
    %c0_i32_0 = arith.constant 0 : i32
    %c0_i32_1 = arith.constant 0 : i32
    return %arg0, %c0_i32, %c0_i32_0 : i32, i32, i32
  }
}

</mosaic_0001>

<bundles_post_ra>
// kernel: tpu_custom_call.1
= control target key start
LH: loop header
LB: loop body
LE: loop exit
PB: predicated region body
PF: predicated region fallthrough
CT: control target
= control target key end

     0   :  { %14 = vsyncpa [#allocation4], 0  ;;  %s2034_s0 = inlined_call_operand.hbm [shape: bf16[1,4,512], index: 0, kind: input, shape index: {}]   ;;  %s2035_s1 = inlined_call_operand.vmem [shape: bf16[1,64,8], index: 1, kind: input, shape index: {}]   ;;  %s2036_s2 = inlined_call_operand.hbm [shape: bf16[4,4], index: 2, kind: input, shape index: {}]   ;;  %s2037_s3 = inlined_call_operand.vmem [shape: bf16[4,4], index: 3, kind: input, shape index: {}]   ;;  %s2038_s4 = inlined_call_operand.vmem [shape: bf16[18,8], index: 4, kind: input, shape index: {}]   ;;  %s2039_s5 = inlined_call_operand.vmem [shape: bf16[8,512], index: 5, kind: input, shape index: {}]   ;;  %s2040_s6 = inlined_call_operand.vmem [shape: f32[8,512], index: 6, kind: input, shape index: {}]   ;;  %s2041_s7 = inlined_call_operand.hbm [shape: f32[18,512], index: 7, kind: input, shape index: {}]   ;;  %s2042_s8 = inlined_call_operand.hbm [shape: f32[2,512], index: 8, kind: input, shape index: {}]   ;;  %s2043_s9 = inlined_call_operand.hbm [shape: f32[1,4,512], index: 9, kind: output, shape index: {}]  }
   0x1   :  { %15 = vsyncpa [#allocation7], 0 }
   0x2   :  { %16 = vsyncpa [#allocation10], 0  ;;  %s36_s11 = sshll.u32 %s2036_s2, 4  ;;  %s37_s11 = int_to_ptr.hbm [resolvable:$true] %s36_s11 }
   0x3   :  { %17 = vsyncpa [#allocation5], 0  ;;  %s1567_s12 = smov [#allocation6]   ;;  %s23_s16 = sshll.u32 %s2034_s0, 4  ;;  %s24_s16 = int_to_ptr.hbm [resolvable:$true] %s23_s16 }
   0x4   :  { %s38_s13 = sshll.u32 %s1567_s12, 4  ;;  %s1568_s17 = smov [#allocation3]   ;;  %s39_s13 = int_to_ptr.vmem [resolvable:$true] %s38_s13 }
   0x5   :  { %41 = dma.hbm_to_vmem [thread:$0]  %s37_s11, 32, %s39_s13, [#allocation7]  }
   0x6   :  { %s25_s18 = sshll.u32 %s1568_s17, 4  ;;  %s54_s21 = sshll.u32 %s2041_s7, 4  ;;  %s26_s18 = int_to_ptr.vmem [resolvable:$true] %s25_s18  ;;  %s55_s21 = int_to_ptr.hbm [resolvable:$true] %s54_s21 }
   0x7   :  { %28 = dma.hbm_to_vmem [thread:$0]  %s24_s16, 128, %s26_s18, [#allocation4]  }
   0x8   :  { %s1569_s2 = smov [#allocation8]   ;;  %s68_s25 = sshll.u32 %s2042_s8, 4  ;;  %s69_s25 = int_to_ptr.hbm [resolvable:$true] %s68_s25 }
   0x9   :  { %s56_s22 = sshll.u32 %s1569_s2, 4  ;;  %s1570_s26 = smov 512   ;;  %s57_s22 = int_to_ptr.vmem [resolvable:$true] %s56_s22 }
   0xa   :  { %s1571_s0 = smov 32   ;;  %s1572_s27 = smov [#allocation9]  }
   0xb   :  { %62 = dma.hbm_to_vmem [thread:$0]  %s55_s21, 1536, %s57_s22, [#allocation7], %s1570_s26, %s1570_s26, %s1571_s0  }
   0xc   :  { %s70_s28 = sshll.u32 %s1572_s27, 4  ;;  %s71_s28 = int_to_ptr.vmem [resolvable:$true] %s70_s28 }
   0xd   :  { %73 = dma.hbm_to_vmem [thread:$0]  %s69_s25, 128, %s71_s28, [#allocation10]  }
   0xe   :  { %1559 = dma.done.wait [#allocation4], 128  }
   0xf   :  { %1560 = vsyncadd [#allocation4], 4294967168 }
  0x10   :  { %1561 = dma.done.wait [#allocation7], 1568  }
  0x11   :  { %1562 = vsyncadd [#allocation7], 4294965728 }
  0x12   :  { %1563 = dma.done.wait [#allocation10], 128  }
  0x13   :  { %1564 = vsyncadd [#allocation10], 4294967168  ;;  %v91_v0 = vld [vmem:[#allocation3] sm:$0xff]  ;;  %v180_v1 = vld [vmem:[%s2039_s5] sm:$0xff]  ;;  %vm212_vm0 = vcmask 1043456   ;;  %vm103_vm1 = vcmask 1041408  }
  0x14   :  { %94 = vst [vmem:[#allocation1] ss:$4 sm:$0xff] %v91_v0  ;;  %v201_v2 = vunpack.c.l.b16 %v180_v1  ;;  %v202_v3 = vunpack.c.h.b16 %v180_v1  ;;  %v92_v12 = vld [vmem:[#allocation6] sm:$0x3]  ;;  %vm99_vm2 = vcmask 31744   ;;  %v1408_v13 = vld [vmem:[%s2035_s1] sm:$0xff] }
  0x15   :  { %vm205_vm3 = vcmask 64512   ;;  %v1409_v14 = vld [vmem:[%s2035_s1 + $0x8] sm:$0xff]  ;;  %v182_v29 = vld [vmem:[%s2040_s6] sm:$0xff]  ;;  %s1575_s29 = smov 16   ;;  %s1576_s8 = smov 127   ;;  %vm882_vm12 = vcmask 1045508  }
  0x16   :  { %v203_v4 = vpack.c.b16 %v201_v2, %v201_v2  ;;  %v204_v5 = vpack.c.b16 %v202_v3, %v202_v3  ;;  %v183_v30 = vld [vmem:[%s2040_s6 + $0x8] sm:$0xff]  ;;  %v269_v31 = vperm.slane %v182_v29, 3  ;;  %v261_v33 = vperm.slane %v182_v29, 1  ;;  %s1577_s30 = smov 15   ;;  %s1578_s10 = smov 112  }
  0x17   :  { %v270_v32 = vperm.slane %v183_v30, 3  ;;  %v262_v34 = vperm.slane %v183_v30, 1  ;;  %v277_v37 = vperm.slane %v182_v29, 5  ;;  %v278_v38 = vperm.slane %v183_v30, 5  ;;  %s1579_s11 = smov 113   ;;  %s1580_s12 = smov 111  }
  0x18   :  { %v214_v6 = vsel %vm212_vm0, %v203_v4, 0  ;;  %v217_v7 = vsel %vm212_vm0, %v204_v5, 0  ;;  %v258_v42 = vperm.slane %v183_v30, 0  ;;  %v265_v44 = vperm.slane %v182_v29, 2  ;;  %v181_v5 = vld [vmem:[%s2039_s5 + $0x8] sm:$0xff]  ;;  %s1328_s22 = sshll.u32 %s2043_s9, 4  ;;  %s1329_s22 = int_to_ptr.hbm [resolvable:$true] %s1328_s22 }
  0x19   :  { %v266_v45 = vperm.slane %v183_v30, 2  ;;  %v274_v46 = vperm.slane %v183_v30, 4  ;;  %v285_v49 = vperm.slane %v182_v29, 7  ;;  %v286_v50 = vperm.slane %v183_v30, 7 }
  0x1a   :  { %v257_v51 = vperm.slane %v182_v29, 0  ;;  %v273_v54 = vperm.slane %v182_v29, 4  ;;  %v281_v57 = vperm.slane %v182_v29, 6  ;;  %v282_v58 = vperm.slane %v183_v30, 6 }
  0x1b   :  { %v95_v8 = vld.sshfl [vmem:[#allocation1] sm:$0xff pattern:$0x73625140]  ;;  %v96_v9 = vld.sshfl [vmem:[#allocation1 + $0x8] sm:$0xff pattern:$0x73625140] }
  0x1c   :  { %v104_v10 = vsel %vm103_vm1, %v95_v8, 0  ;;  %v106_v11 = vsel %vm103_vm1, %v96_v9, 0  ;;  %v97_v15 = vld.sshfl [vmem:[#allocation1 + $0x10] sm:$0xff pattern:$0x73625140] }
  0x1d   :  { %119 = vmatpush.bf16.msra.mxu0 %v104_v10  ;;  %132 = vmatpush.bf16.msra.mxu1 %v106_v11  ;;  %v108_v16 = vsel %vm103_vm1, %v97_v15, 0  ;;  %v98_v21 = vld.sshfl [vmem:[#allocation1 + $0x18] sm:$0xff pattern:$0x73625140] }
  0x1e   :  { %145 = vmatpush.bf16.msra.mxu2 %v108_v16  ;;  %v110_v22 = vsel %vm103_vm1, %v98_v21, 0  ;;  %v382_v16 = vunpack.c.l.b16 %v181_v5 }
  0x1f   :  { %158 = vmatpush.bf16.msra.mxu3 %v110_v22 }
  0x20   :  { %1340 = vmatmul.msk.bf16.vlgmr.msra.gmra.mxu0 %vm99_vm2, %v92_v12  ;;  %1341 = vmatmul.msk.bf16.vlgmr.msra.gmra.mxu1 %vm99_vm2, %v92_v12 }
  0x21   :  { %226 = vmatpush.bf16.msrb.mxu0 %v214_v6  ;;  %245 = vmatpush.bf16.msrb.mxu1 %v217_v7 }
  0x22   :  { %1342 = vmatmul.msk.bf16.vlgmr.msra.gmra.mxu2 %vm99_vm2, %v92_v12  ;;  %1343 = vmatmul.msk.bf16.vlgmr.msra.gmra.mxu3 %vm99_vm2, %v92_v12 }
  0x30   :  { %1352 = vmatmul.msk.bf16.vlgmr.msrb.gmra.mxu0 %vm205_vm3, %v1408_v13  ;;  %1354 = vmatmul.msk.bf16.vlgmr.msrb.gmra.mxu1 %vm205_vm3, %v1408_v13 }
  0x40   :  { %1353 = vmatmul.msk.bf16.gmra.mxu0 %vm205_vm3, %v1409_v14  ;;  %1355 = vmatmul.msk.bf16.gmra.mxu1 %vm205_vm3, %v1409_v14 }
  0x9d   :  { %v121_v17 = vpop.f32.mrf.mxu0  ;;  %v134_v18 = vpop.f32.mrf.mxu1 }
  0x9e   :  { %v168_v19 = vrot.slane %v121_v17, 4  ;;  %v169_v20 = vrot.slane %v134_v18, 4  ;;  %v383_v17 = vunpack.c.h.b16 %v181_v5 }
  0xa0   :  { %176 = vst [vmem:[#allocation2 + $0x10] sm:$0xf0] %v168_v19 }
  0xa1   :  { %177 = vst [vmem:[#allocation2] sm:$0xf0] %v169_v20 }
  0xa5   :  { %v123_v23 = vpop.f32.mrf.mxu0  ;;  %v136_v24 = vpop.f32.mrf.mxu1 }
  0xad   :  { %v228_v25 = vpop.f32.mrf.mxu0  ;;  %v247_v26 = vpop.f32.mrf.mxu1 }
  0xae   :  { %v263_v41 = vmul.f32 %v261_v33, %v228_v25  ;;  %v264_v43 = vmul.f32 %v262_v34, %v247_v26  ;;  %v260_v56 = vmul.f32 %v258_v42, %v247_v26  ;;  %v259_v6 = vmul.f32 %v257_v51, %v228_v25  ;;  %v160_v42 = vpop.f32.mrf.mxu3 }
  0xaf   :  { %v384_v25 = vpack.c.b16 %v382_v16, %v382_v16 }
  0xb0   :  { %v291_v55 = vrot.slane %v263_v41, 4  ;;  %v292_v59 = vrot.slane %v264_v43, 4  ;;  %v171_v43 = vrot.slane %v160_v42, 4 }
  0xb2   :  { %v295_v14 = vadd.f32 %v291_v55, %v259_v6  ;;  %v296_v15 = vadd.f32 %v292_v59, %v260_v56  ;;  %179 = vst [vmem:[#allocation2 + $0x8] sm:$0xf0] %v171_v43 }
  0xb5   :  { %v230_v27 = vpop.f32.mrf.mxu0  ;;  %v249_v28 = vpop.f32.mrf.mxu1 }
  0xb6   :  { %v271_v39 = vmul.f32 %v269_v31, %v230_v27  ;;  %v272_v40 = vmul.f32 %v270_v32, %v249_v28  ;;  %v267_v60 = vmul.f32 %v265_v44, %v230_v27  ;;  %v268_v61 = vmul.f32 %v266_v45, %v249_v28  ;;  %v162_v44 = vpop.f32.mrf.mxu3 }
  0xb7   :  { %v385_v27 = vpack.c.b16 %v383_v17, %v383_v17  ;;  %v393_v32 = vsel %vm212_vm0, %v384_v25, 0 }
  0xb8   :  { %v299_v52 = vrot.slane %v271_v39, 4  ;;  %v300_v53 = vrot.slane %v272_v40, 4  ;;  %v147_v39 = vpop.f32.mrf.mxu2 }
  0xb9   :  { %v396_v33 = vsel %vm212_vm0, %v385_v27, 0  ;;  %v170_v40 = vrot.slane %v147_v39, 4 }
  0xba   :  { %v303_v7 = vadd.f32 %v299_v52, %v267_v60  ;;  %v304_v8 = vadd.f32 %v300_v53, %v268_v61  ;;  %v184_v53 = vld [vmem:[%s2040_s6 + $0x10] sm:$0xff] }
  0xbb   :  { %178 = vst [vmem:[#allocation2 + $0x18] sm:$0xf0] %v170_v40  ;;  %v448_v55 = vperm.slane %v184_v53, 3  ;;  %v456_v61 = vperm.slane %v184_v53, 5  ;;  %v460_v17 = vperm.slane %v184_v53, 6 }
  0xbc   :  { %v321_v22 = vadd.f32 %v303_v7, %v295_v14  ;;  %v322_v24 = vadd.f32 %v304_v8, %v296_v15  ;;  %v452_v14 = vperm.slane %v184_v53, 4 }
  0xbd   :  { %v233_v35 = vpop.f32.mrf.mxu0  ;;  %v252_v36 = vpop.f32.mrf.mxu1 }
  0xbe   :  { %v279_v47 = vmul.f32 %v277_v37, %v233_v35  ;;  %v280_v48 = vmul.f32 %v278_v38, %v252_v36  ;;  %v276_v62 = vmul.f32 %v274_v46, %v252_v36  ;;  %v275_v9 = vmul.f32 %v273_v54, %v233_v35  ;;  %v327_v36 = vld [vmem:[%s2037_s3] sm:$0x3]  ;;  %v1410_v37 = vld [vmem:[%s2035_s1 + $0x10] sm:$0xff]  ;;  %v1411_v38 = vld [vmem:[%s2035_s1 + $0x18] sm:$0xff] }
  0xbf   :  { %v185_v54 = vld [vmem:[%s2040_s6 + $0x18] sm:$0xff] }
  0xc0   :  { %v307_v1 = vrot.slane %v279_v47, 4  ;;  %v308_v2 = vrot.slane %v280_v48, 4  ;;  %v149_v41 = vpop.f32.mrf.mxu2  ;;  %v449_v56 = vperm.slane %v185_v54, 3  ;;  %v445_v5 = vperm.slane %v185_v54, 2 }
  0xc1   :  { %v453_v6 = vperm.slane %v185_v54, 4 }
  0xc2   :  { %v311_v18 = vadd.f32 %v307_v1, %v275_v9  ;;  %v312_v19 = vadd.f32 %v308_v2, %v276_v62  ;;  %v457_v62 = vperm.slane %v185_v54, 5  ;;  %v437_v2 = vperm.slane %v185_v54, 0 }
  0xc3   :  { %v464_v9 = vperm.slane %v184_v53, 7 }
  0xc5   :  { %v235_v63 = vpop.f32.mrf.mxu0  ;;  %v254_v0 = vpop.f32.mrf.mxu1 }
  0xc6   :  { %v287_v3 = vmul.f32 %v285_v49, %v235_v63  ;;  %v288_v4 = vmul.f32 %v286_v50, %v254_v0  ;;  %v283_v10 = vmul.f32 %v281_v57, %v235_v63  ;;  %v284_v12 = vmul.f32 %v282_v58, %v254_v0 }
  0xc7   :  { %v440_v57 = vperm.slane %v184_v53, 1  ;;  %v441_v58 = vperm.slane %v185_v54, 1 }
  0xc8   :  { %v315_v11 = vrot.slane %v287_v3, 4  ;;  %v316_v13 = vrot.slane %v288_v4, 4  ;;  %v444_v4 = vperm.slane %v184_v53, 2 }
  0xca   :  { %v319_v20 = vadd.f32 %v315_v11, %v283_v10  ;;  %v320_v21 = vadd.f32 %v316_v13, %v284_v12  ;;  %v465_v10 = vperm.slane %v185_v54, 7  ;;  %v436_v11 = vperm.slane %v184_v53, 0 }
  0xcc   :  { %v323_v23 = vadd.f32 %v319_v20, %v311_v18  ;;  %v324_v26 = vadd.f32 %v320_v21, %v312_v19  ;;  %v461_v18 = vperm.slane %v185_v54, 6 }
  0xce   :  { %v325_v28 = vadd.f32 %v323_v23, %v321_v22  ;;  %v326_v29 = vadd.f32 %v324_v26, %v322_v24 }
  0xd0   :  { %v328_v30 = vpack.c.bf16 %v325_v28, %v325_v28  ;;  %v329_v31 = vpack.c.bf16 %v326_v29, %v326_v29 }
  0xd2   :  { %v334_v34 = vsel %vm103_vm1, %v328_v30, 0  ;;  %v337_v35 = vsel %vm103_vm1, %v329_v31, 0 }
  0xd3   :  { %346 = vmatpush.bf16.msrb.mxu2 %v334_v34  ;;  %359 = vmatpush.bf16.msrb.mxu3 %v337_v35 }
  0xd6   :  { %1356 = vmatmul.msk.bf16.vlgmr.msrb.gmra.mxu2 %vm99_vm2, %v327_v36  ;;  %1357 = vmatmul.msk.bf16.vlgmr.msrb.gmra.mxu3 %vm99_vm2, %v327_v36 }
  0xd7   :  { %405 = vmatpush.bf16.msra.mxu2 %v393_v32  ;;  %424 = vmatpush.bf16.msra.mxu3 %v396_v33 }
  0xe6   :  { %1366 = vmatmul.msk.bf16.vlgmr.msra.gmra.mxu2 %vm205_vm3, %v1410_v37  ;;  %1368 = vmatmul.msk.bf16.vlgmr.msra.gmra.mxu3 %vm205_vm3, %v1410_v37 }
  0xf6   :  { %1367 = vmatmul.msk.bf16.gmra.mxu2 %vm205_vm3, %v1411_v38  ;;  %1369 = vmatmul.msk.bf16.gmra.mxu3 %vm205_vm3, %v1411_v38 }
 0x159   :  { %v348_v45 = vpop.f32.mrf.mxu2  ;;  %v361_v46 = vpop.f32.mrf.mxu3 }
 0x15a   :  { %365 = vst [vmem:[#allocation2 + $0x10] sm:$0xf] %v348_v45 }
 0x15b   :  { %366 = vst [vmem:[#allocation2] sm:$0xf] %v361_v46 }
 0x161   :  { %v350_v47 = vpop.f32.mrf.mxu2  ;;  %v363_v48 = vpop.f32.mrf.mxu3 }
 0x162   :  { %v549_v47 = vld [vmem:[#allocation2 + $0x10] sm:$0xff]  ;;  %v550_v48 = vld [vmem:[#allocation2] sm:$0xff] }
 0x169   :  { %v407_v49 = vpop.f32.mrf.mxu2  ;;  %v426_v50 = vpop.f32.mrf.mxu3 }
 0x16a   :  { %v442_v1 = vmul.f32 %v440_v57, %v407_v49  ;;  %v443_v3 = vmul.f32 %v441_v58, %v426_v50  ;;  %v439_v16 = vmul.f32 %v437_v2, %v426_v50  ;;  %v438_v29 = vmul.f32 %v436_v11, %v407_v49  ;;  %v656_v11 = vld [vmem:[#allocation8 + $0x8] sm:$0xff] }
 0x16c   :  { %v470_v15 = vrot.slane %v442_v1, 4  ;;  %v471_v19 = vrot.slane %v443_v3, 4 }
 0x16e   :  { %v474_v37 = vadd.f32 %v470_v15, %v438_v29  ;;  %v475_v38 = vadd.f32 %v471_v19, %v439_v16 }
 0x171   :  { %v409_v51 = vpop.f32.mrf.mxu2  ;;  %v428_v52 = vpop.f32.mrf.mxu3 }
 0x172   :  { %v450_v63 = vmul.f32 %v448_v55, %v409_v51  ;;  %v451_v0 = vmul.f32 %v449_v56, %v428_v52  ;;  %v446_v20 = vmul.f32 %v444_v4, %v409_v51  ;;  %v447_v21 = vmul.f32 %v445_v5, %v428_v52 }
 0x173   :  { %v553_v51 = vpack.c.bf16 %v549_v47, %v549_v47  ;;  %v554_v52 = vpack.c.bf16 %v550_v48, %v550_v48  ;;  %v657_v47 = vld [vmem:[#allocation8 + $0x10] sm:$0xff]  ;;  %v658_v48 = vld [vmem:[#allocation8 + $0x18] sm:$0xff] }
 0x174   :  { %v478_v12 = vrot.slane %v450_v63, 4  ;;  %v479_v13 = vrot.slane %v451_v0, 4 }
 0x175   :  { %v572_v57 = vsel %vm212_vm0, %v553_v51, 0  ;;  %v575_v58 = vsel %vm212_vm0, %v554_v52, 0 }
 0x176   :  { %v482_v30 = vadd.f32 %v478_v12, %v446_v20  ;;  %v483_v31 = vadd.f32 %v479_v13, %v447_v21 }
 0x178   :  { %v500_v43 = vadd.f32 %v482_v30, %v474_v37  ;;  %v501_v44 = vadd.f32 %v483_v31, %v475_v38 }
 0x179   :  { %v412_v59 = vpop.f32.mrf.mxu2  ;;  %v431_v60 = vpop.f32.mrf.mxu3 }
 0x17a   :  { %v458_v7 = vmul.f32 %v456_v61, %v412_v59  ;;  %v459_v8 = vmul.f32 %v457_v62, %v431_v60  ;;  %v455_v22 = vmul.f32 %v453_v6, %v431_v60  ;;  %v454_v32 = vmul.f32 %v452_v14, %v412_v59  ;;  %v506_v59 = vld [vmem:[%s2037_s3] sm:$0x3]  ;;  %v548_v61 = vld [vmem:[%s2038_s4 + $0x8] sm:$0x1]  ;;  %s1573_s3 = smov 17  }
 0x17b   :  { %v1412_v60 = vld [vmem:[%s2038_s4] sm:$0xff]  ;;  %v562_v62 = vunpack.c.l.b16 %v548_v61  ;;  %s1574_s4 = smov 1  }
 0x17c   :  { %v486_v26 = vrot.slane %v458_v7, 4  ;;  %v487_v25 = vrot.slane %v459_v8, 4 }
 0x17d   :  { %v564_v63 = vpack.c.b16 %v562_v62, %v562_v62  ;;  %v662_v62 = vld [vmem:[#allocation8 + $0x38] sm:$0xff] }
 0x17e   :  { %v490_v39 = vadd.f32 %v486_v26, %v454_v32  ;;  %v491_v40 = vadd.f32 %v487_v25, %v455_v22 }
 0x181   :  { %v414_v23 = vpop.f32.mrf.mxu2  ;;  %v433_v24 = vpop.f32.mrf.mxu3 }
 0x182   :  { %v466_v27 = vmul.f32 %v464_v9, %v414_v23  ;;  %v467_v28 = vmul.f32 %v465_v10, %v433_v24  ;;  %v462_v33 = vmul.f32 %v460_v17, %v414_v23  ;;  %v463_v35 = vmul.f32 %v461_v18, %v433_v24  ;;  %v655_v10 = vld [vmem:[#allocation8] sm:$0xff]  ;;  %v660_v24 = vld [vmem:[#allocation8 + $0x28] sm:$0xff] }
 0x183   :  { %v659_v18 = vld [vmem:[#allocation8 + $0x20] sm:$0xff] }
 0x184   :  { %v494_v34 = vrot.slane %v466_v27, 4  ;;  %v495_v36 = vrot.slane %v467_v28, 4 }
 0x186   :  { %v498_v41 = vadd.f32 %v494_v34, %v462_v33  ;;  %v499_v42 = vadd.f32 %v495_v36, %v463_v35  ;;  %v663_v34 = vld [vmem:[#allocation8 + $0x40] sm:$0x3] }
 0x188   :  { %v502_v45 = vadd.f32 %v498_v41, %v490_v39  ;;  %v503_v46 = vadd.f32 %v499_v42, %v491_v40  ;;  %v687_v39 = vlaneseq }
 0x18a   :  { %v504_v49 = vadd.f32 %v502_v45, %v500_v43  ;;  %v505_v50 = vadd.f32 %v503_v46, %v501_v44  ;;  %v1756_v41 = vand.u32 127, %v687_v39 }
 0x18c   :  { %v507_v53 = vpack.c.bf16 %v504_v49, %v504_v49  ;;  %v508_v54 = vpack.c.bf16 %v505_v50, %v505_v50  ;;  %vm714_vm4 = vcmp.lt.s32.totalorder %v1756_v41, 16  ;;  %vm689_vm5 = vcmp.lt.s32.totalorder %v1756_v41, 17 }
 0x18d   :  { %vm802_vm6 = vcmp.lt.s32.totalorder %v1756_v41, 113  ;;  %vm823_vm7 = vcmp.lt.s32.totalorder %v1756_v41, 112  ;;  %vm781_vm8 = vcmp.lt.s32.totalorder %v1756_v41, 127  ;;  %vm756_vm9 = vcmp.lt.s32.totalorder %v1756_v41, 1 }
 0x18e   :  { %v513_v55 = vsel %vm103_vm1, %v507_v53, 0  ;;  %v516_v56 = vsel %vm103_vm1, %v508_v54, 0  ;;  %vm735_vm10 = vcmp.lt.s32.totalorder %v1756_v41, 15  ;;  %vm836_vm11 = vcmp.lt.s32.totalorder %v1756_v41, 111 }
 0x18f   :  { %525 = vmatpush.bf16.msra.mxu0 %v513_v55  ;;  %538 = vmatpush.bf16.msra.mxu1 %v516_v56 }
 0x192   :  { %1370 = vmatmul.msk.bf16.vlgmr.msra.gmra.mxu0 %vm99_vm2, %v506_v59  ;;  %1371 = vmatmul.msk.bf16.vlgmr.msra.gmra.mxu1 %vm99_vm2, %v506_v59 }
 0x193   :  { %590 = vmatpush.bf16.msrb.mxu0 %v572_v57  ;;  %608 = vmatpush.bf16.msrb.mxu1 %v575_v58 }
 0x1a2   :  { %1376 = vmatmul.msk.bf16.vlgmr.msrb.gmra.mxu0 %vm205_vm3, %v1412_v60  ;;  %1378 = vmatmul.msk.bf16.vlgmr.msrb.gmra.mxu1 %vm205_vm3, %v1412_v60 }
 0x1b2   :  { %1377 = vmatmul.msk.bf16.gmra.mxu0 %vm205_vm3, %v564_v63  ;;  %1379 = vmatmul.msk.bf16.gmra.mxu1 %vm205_vm3, %v564_v63 }
 0x20f   :  { %v527_v0 = vpop.f32.mrf.mxu0  ;;  %v540_v1 = vpop.f32.mrf.mxu1 }
 0x210   :  { %544 = vst [vmem:[#allocation2 + $0x18] sm:$0xf] %v527_v0 }
 0x211   :  { %545 = vst [vmem:[#allocation2 + $0x8] sm:$0xf] %v540_v1 }
 0x217   :  { %v529_v2 = vpop.f32.mrf.mxu0  ;;  %v542_v3 = vpop.f32.mrf.mxu1  ;;  %v551_v4 = vld [vmem:[#allocation2 + $0x18] sm:$0xff] }
 0x218   :  { %v555_v5 = vpack.c.bf16 %v551_v4, %v551_v4  ;;  %v552_v6 = vld [vmem:[#allocation2 + $0x8] sm:$0xff] }
 0x219   :  { %v556_v7 = vpack.c.bf16 %v552_v6, %v552_v6 }
 0x21a   :  { %v578_v8 = vsel %vm212_vm0, %v555_v5, 0 }
 0x21b   :  { %626 = vmatpush.bf16.msrb.mxu2 %v578_v8  ;;  %v581_v9 = vsel %vm212_vm0, %v556_v7, 0 }
 0x21c   :  { %644 = vmatpush.bf16.msrb.mxu3 %v581_v9 }
 0x21e   :  { %1380 = vmatmul.msk.bf16.vlgmr.msrb.gmra.mxu2 %vm205_vm3, %v1412_v60 }
 0x21f   :  { %1382 = vmatmul.msk.bf16.vlgmr.msrb.gmra.mxu3 %vm205_vm3, %v1412_v60  ;;  %v592_v12 = vpop.f32.mrf.mxu0  ;;  %v610_v13 = vpop.f32.mrf.mxu1  ;;  %v661_v60 = vld [vmem:[#allocation8 + $0x30] sm:$0xff] }
 0x220   :  { %v667_v14 = vmul.f32 %v655_v10, %v592_v12  ;;  %v668_v15 = vmul.f32 %v656_v11, %v610_v13  ;;  %v665_v11 = vld [vmem:[#allocation8 + $0x50] sm:$0x3]  ;;  %v664_v12 = vld [vmem:[#allocation8 + $0x48] sm:$0x3] }
 0x222   :  { %679 = vrot.lane.b32.xlu0 %v667_v14, %s1573_s3  ;;  %v741_v16 = vrot.slane %v668_v15, 6  ;;  %v698_v17 = vrot.slane %v667_v14, 2  ;;  %v699_v21 = vrot.slane %v668_v15, 2  ;;  %v720_v26 = vrot.slane %v668_v15, 4 }
 0x223   :  { %v719_v27 = vrot.slane %v667_v14, 4  ;;  %v740_v29 = vrot.slane %v667_v14, 6 }
 0x224   :  { %750 = vrot.lane.b32.xlu1 %v741_v16, %s1574_s4  ;;  %706 = vrot.lane.b32.xlu2 %v698_v17, %s1575_s29  ;;  %v666_v17 = vld [vmem:[#allocation8 + $0x58] sm:$0x3] }
 0x227   :  { %v594_v19 = vpop.f32.mrf.mxu0  ;;  %v612_v23 = vpop.f32.mrf.mxu1 }
 0x228   :  { %v1727_v20 = vmul.f32 %v659_v18, %v594_v19  ;;  %v1733_v25 = vmul.f32 %v660_v24, %v612_v23 }
 0x22a   :  { %681 = vrot.lane.b32.xlu0 %v668_v15, %s1573_s3  ;;  %v765_v22 = vrot.slane %v1727_v20, 2  ;;  %v808_v28 = vrot.slane %v1733_v25, 6  ;;  %v766_v30 = vrot.slane %v1733_v25, 2  ;;  %v787_v31 = vrot.slane %v1733_v25, 4 }
 0x22b   :  { %v786_v32 = vrot.slane %v1727_v20, 4  ;;  %v807_v33 = vrot.slane %v1727_v20, 6 }
 0x22c   :  { %773 = vrot.lane.b32.xlu1 %v765_v22, %s1576_s8  ;;  %708 = vrot.lane.b32.xlu2 %v699_v21, %s1575_s29 }
 0x22e   :  { %1381 = vmatmul.msk.bf16.gmra.mxu2 %vm205_vm3, %v564_v63 }
 0x22f   :  { %1383 = vmatmul.msk.bf16.gmra.mxu3 %vm205_vm3, %v564_v63  ;;  %v597_v35 = vpop.f32.mrf.mxu0  ;;  %v615_v49 = vpop.f32.mrf.mxu1 }
 0x230   :  { %v675_v36 = vmul.f32 %v663_v34, %v597_v35  ;;  %v676_v15 = vmul.f32 %v664_v12, %v615_v49 }
 0x232   :  { %729 = vrot.lane.b32.xlu0 %v720_v26, %s1577_s30 }
 0x234   :  { %727 = vrot.lane.b32.xlu2 %v719_v27, %s1577_s30  ;;  %817 = vrot.lane.b32.xlu1 %v808_v28, %s1578_s10 }
 0x237   :  { %v599_v37 = vpop.f32.mrf.mxu0  ;;  %v617_v56 = vpop.f32.mrf.mxu1 }
 0x23a   :  { %748 = vrot.lane.b32.xlu0 %v740_v29, %s1574_s4 }
 0x23c   :  { %775 = vrot.lane.b32.xlu2 %v766_v30, %s1576_s8  ;;  %828 = vrot.lane.b32.xlu1 %v675_v36, %s1580_s12 }
 0x242   :  { %796 = vrot.lane.b32.xlu0 %v787_v31, %s1579_s11 }
 0x244   :  { %794 = vrot.lane.b32.xlu2 %v786_v32, %s1579_s11 }
 0x24a   :  { %815 = vrot.lane.b32.xlu0 %v807_v33, %s1578_s10 }
 0x27e   :  { %v1751_v38 = vpop.permute.xlu2 %706 }
 0x286   :  { %v1759_v42 = vpop.permute.xlu2 %708 }
 0x287   :  { %v717_v43 = vsel %vm714_vm4, %v1751_v38, %v1759_v42 }
 0x28e   :  { %v728_v24 = vpop.permute.xlu2 %727 }
 0x294   :  { %v1753_v40 = vpop.permute.xlu0 %679 }
 0x296   :  { %v751_v19 = vpop.permute.xlu1 %750  ;;  %v776_v28 = vpop.permute.xlu2 %775 }
 0x29c   :  { %v1766_v44 = vpop.permute.xlu0 %681 }
 0x29d   :  { %v692_v45 = vsel %vm689_vm5, %v1753_v40, %v1766_v44 }
 0x29e   :  { %v1772_v46 = vadd.f32 %v717_v43, %v692_v45  ;;  %v774_v22 = vpop.permute.xlu1 %773  ;;  %v795_v31 = vpop.permute.xlu2 %794 }
 0x2a1   :  { %v628_v50 = vpop.f32.mrf.mxu2 }
 0x2a2   :  { %v669_v51 = vmul.f32 %v657_v47, %v628_v50  ;;  %v646_v52 = vpop.f32.mrf.mxu3  ;;  %v784_v47 = vsel %vm781_vm8, %v774_v22, %v776_v28 }
 0x2a3   :  { %v670_v53 = vmul.f32 %v658_v48, %v646_v52 }
 0x2a4   :  { %683 = vrot.lane.b32.xlu1 %v669_v51, %s1573_s3  ;;  %v700_v54 = vrot.slane %v669_v51, 2  ;;  %v742_v61 = vrot.slane %v669_v51, 6  ;;  %v721_v7 = vrot.slane %v669_v51, 4  ;;  %v730_v21 = vpop.permute.xlu0 %729 }
 0x2a5   :  { %v722_v55 = vrot.slane %v670_v53, 4  ;;  %v743_v59 = vrot.slane %v670_v53, 6  ;;  %v701_v2 = vrot.slane %v670_v53, 2 }
 0x2a6   :  { %710 = vrot.lane.b32.xlu0 %v700_v54, %s1575_s29  ;;  %v818_v26 = vpop.permute.xlu1 %817  ;;  %v849_v54 = vadd.f32 %v784_v47, %v1727_v20 }
 0x2a7   :  { %733 = vrot.lane.b32.xlu2 %v722_v55, %s1577_s30 }
 0x2a9   :  { %v630_v57 = vpop.f32.mrf.mxu2 }
 0x2aa   :  { %v648_v58 = vpop.f32.mrf.mxu3  ;;  %v1780_v63 = vmul.f32 %v661_v60, %v630_v57 }
 0x2ab   :  { %v1782_v0 = vmul.f32 %v662_v62, %v648_v58 }
 0x2ac   :  { %685 = vrot.lane.b32.xlu1 %v670_v53, %s1573_s3  ;;  %v767_v4 = vrot.slane %v1780_v63, 2  ;;  %v809_v10 = vrot.slane %v1780_v63, 6  ;;  %v788_v16 = vrot.slane %v1780_v63, 4  ;;  %v749_v23 = vpop.permute.xlu0 %748 }
 0x2ad   :  { %v789_v5 = vrot.slane %v1782_v0, 4  ;;  %v810_v9 = vrot.slane %v1782_v0, 6  ;;  %v768_v13 = vrot.slane %v1782_v0, 2 }
 0x2ae   :  { %754 = vrot.lane.b32.xlu0 %v743_v59, %s1574_s4  ;;  %v1801_v29 = vpop.permute.xlu1 %828 }
 0x2af   :  { %752 = vrot.lane.b32.xlu2 %v742_v61, %s1574_s4 }
 0x2b1   :  { %v633_v1 = vpop.f32.mrf.mxu2 }
 0x2b2   :  { %v651_v3 = vpop.f32.mrf.mxu3  ;;  %v677_v14 = vmul.f32 %v665_v11, %v633_v1 }
 0x2b3   :  { %v678_v18 = vmul.f32 %v666_v17, %v651_v3 }
 0x2b4   :  { %712 = vrot.lane.b32.xlu1 %v701_v2, %s1575_s29  ;;  %v797_v27 = vpop.permute.xlu0 %796  ;;  %v738_v2 = vsel %vm735_vm10, %v728_v24, %v730_v21 }
 0x2b5   :  { %v805_v37 = vsel %vm802_vm6, %v795_v31, %v797_v27 }
 0x2b6   :  { %777 = vrot.lane.b32.xlu0 %v767_v4, %s1576_s8 }
 0x2b7   :  { %800 = vrot.lane.b32.xlu2 %v789_v5, %s1579_s11 }
 0x2b9   :  { %v635_v6 = vpop.f32.mrf.mxu2 }
 0x2ba   :  { %v653_v8 = vpop.f32.mrf.mxu3 }
 0x2bc   :  { %731 = vrot.lane.b32.xlu1 %v721_v7, %s1577_s30  ;;  %v816_v30 = vpop.permute.xlu0 %815 }
 0x2bd   :  { %v826_v43 = vsel %vm823_vm7, %v816_v30, %v818_v26 }
 0x2be   :  { %821 = vrot.lane.b32.xlu0 %v810_v9, %s1578_s10  ;;  %v853_v49 = vadd.f32 %v826_v43, %v805_v37 }
 0x2bf   :  { %819 = vrot.lane.b32.xlu2 %v809_v10, %s1578_s10 }
 0x2c0   :  { %v861_v57 = vadd.f32 %v853_v49, %v849_v54 }
 0x2c4   :  { %779 = vrot.lane.b32.xlu1 %v768_v13, %s1576_s8 }
 0x2c6   :  { %832 = vrot.lane.b32.xlu0 %v677_v14, %s1580_s12 }
 0x2c7   :  { %830 = vrot.lane.b32.xlu2 %v676_v15, %s1580_s12 }
 0x2cc   :  { %798 = vrot.lane.b32.xlu1 %v788_v16, %s1579_s11 }
 0x2d4   :  { %834 = vrot.lane.b32.xlu1 %v678_v18, %s1580_s12 }
 0x301   :  { %v734_v34 = vpop.permute.xlu2 %733 }
 0x302   :  { %v739_v51 = vsel %vm735_vm10, %v734_v34, %v728_v24 }
 0x309   :  { %v753_v45 = vpop.permute.xlu2 %752 }
 0x30a   :  { %v758_v20 = vsel %vm756_vm9, %v751_v19, %v753_v45 }
 0x311   :  { %v801_v60 = vpop.permute.xlu2 %800 }
 0x312   :  { %v806_v8 = vsel %vm802_vm6, %v801_v60, %v795_v31 }
 0x316   :  { %v1803_v32 = vpop.permute.xlu1 %683 }
 0x317   :  { %v691_v9 = vsel %vm689_vm5, %v1766_v44, %v1803_v32 }
 0x318   :  { %v711_v33 = vpop.permute.xlu0 %710 }
 0x319   :  { %v820_v3 = vpop.permute.xlu2 %819  ;;  %v716_v10 = vsel %vm714_vm4, %v1759_v42, %v711_v33 }
 0x31a   :  { %v825_v12 = vsel %vm823_vm7, %v818_v26, %v820_v3 }
 0x31e   :  { %v686_v35 = vpop.permute.xlu1 %685 }
 0x31f   :  { %v693_v52 = vsel %vm689_vm5, %v686_v35, %v1753_v40  ;;  %v759_v40 = vsel %vm756_vm9, %v749_v23, %v751_v19 }
 0x320   :  { %v755_v36 = vpop.permute.xlu0 %754 }
 0x321   :  { %v760_v48 = vsel %vm756_vm9, %v755_v36, %v749_v23  ;;  %v757_v13 = vsel %vm756_vm9, %v753_v45, %v755_v36 }
 0x322   :  { %v845_v55 = vadd.f32 %v760_v48, %v739_v51 }
 0x326   :  { %v713_v50 = vpop.permute.xlu1 %712 }
 0x327   :  { %v718_v53 = vsel %vm714_vm4, %v713_v50, %v1751_v38  ;;  %v846_v38 = vadd.f32 %v759_v40, %v738_v2  ;;  %v715_v44 = vsel %vm714_vm4, %v711_v33, %v713_v50  ;;  %v690_v33 = vsel %vm689_vm5, %v1803_v32, %v686_v35 }
 0x328   :  { %v841_v56 = vadd.f32 %v718_v53, %v693_v52  ;;  %v778_v61 = vpop.permute.xlu0 %777  ;;  %v844_v36 = vadd.f32 %v715_v44, %v690_v33 }
 0x329   :  { %v783_v5 = vsel %vm781_vm8, %v776_v28, %v778_v61  ;;  %v858_v31 = vadd.f32 %v846_v38, %v1772_v46 }
 0x32a   :  { %v857_v58 = vadd.f32 %v845_v55, %v841_v56  ;;  %v850_v42 = vadd.f32 %v783_v5, %v1733_v25 }
 0x32c   :  { %v865_v59 = vadd.f32 %v861_v57, %v857_v58 }
 0x32e   :  { %v732_v62 = vpop.permute.xlu1 %731 }
 0x32f   :  { %v737_v6 = vsel %vm735_vm10, %v730_v21, %v732_v62  ;;  %v736_v11 = vsel %vm735_vm10, %v732_v62, %v734_v34  ;;  %v831_v34 = vpop.permute.xlu2 %830 }
 0x330   :  { %v822_v4 = vpop.permute.xlu0 %821  ;;  %v847_v16 = vadd.f32 %v758_v20, %v737_v6  ;;  %v848_v19 = vadd.f32 %v757_v13, %v736_v11  ;;  %v839_v32 = vsel %vm836_vm11, %v1801_v29, %v831_v34  ;;  %v1887_v20 = vshrl.u32 %v687_v39, 7 }
 0x331   :  { %v827_v14 = vsel %vm823_vm7, %v822_v4, %v816_v30  ;;  %v824_v21 = vsel %vm823_vm7, %v820_v3, %v822_v4  ;;  %v869_v53 = vadd.f32 %v865_v59, %v839_v32 }
 0x332   :  { %v856_v24 = vadd.f32 %v827_v14, %v806_v8  ;;  %v860_v47 = vadd.f32 %v848_v19, %v844_v36 }
 0x336   :  { %v780_v1 = vpop.permute.xlu1 %779 }
 0x337   :  { %v785_v7 = vsel %vm781_vm8, %v780_v1, %v774_v22  ;;  %v782_v15 = vsel %vm781_vm8, %v778_v61, %v780_v1  ;;  %v873_v61 = vld [vmem:[#allocation9] sm:$0xff] }
 0x338   :  { %v852_v17 = vadd.f32 %v785_v7, %v1782_v0  ;;  %v851_v26 = vadd.f32 %v782_v15, %v1780_v63  ;;  %v833_v25 = vpop.permute.xlu0 %832  ;;  %v843_v0 = vadd.f32 %v716_v10, %v691_v9 }
 0x339   :  { %v838_v63 = vsel %vm836_vm11, %v831_v34, %v833_v25 }
 0x33a   :  { %v864_v37 = vadd.f32 %v856_v24, %v852_v17  ;;  %v859_v45 = vadd.f32 %v847_v16, %v843_v0 }
 0x33c   :  { %v868_v50 = vadd.f32 %v864_v37, %v860_v47 }
 0x33e   :  { %v799_v18 = vpop.permute.xlu1 %798 }
 0x33f   :  { %v803_v22 = vsel %vm802_vm6, %v799_v18, %v801_v60  ;;  %v804_v23 = vsel %vm802_vm6, %v797_v27, %v799_v18 }
 0x340   :  { %v854_v28 = vadd.f32 %v825_v12, %v804_v23  ;;  %v855_v30 = vadd.f32 %v824_v21, %v803_v22 }
 0x342   :  { %v862_v43 = vadd.f32 %v854_v28, %v850_v42  ;;  %v863_v27 = vadd.f32 %v855_v30, %v851_v26 }
 0x344   :  { %v866_v48 = vadd.f32 %v862_v43, %v858_v31  ;;  %v867_v46 = vadd.f32 %v863_v27, %v859_v45 }
 0x346   :  { %v870_v49 = vadd.f32 %v866_v48, %v838_v63  ;;  %v835_v51 = vpop.permute.xlu1 %834 }
 0x347   :  { %v837_v35 = vsel %vm836_vm11, %v833_v25, %v835_v51  ;;  %v840_v52 = vsel %vm836_vm11, %v835_v51, %v1801_v29 }
 0x348   :  { %v878_v54 = vrot.slane %v870_v49, 6  ;;  %v871_v55 = vadd.f32 %v867_v46, %v837_v35  ;;  %v872_v56 = vadd.f32 %v868_v50, %v840_v52 }
 0x34a   :  { %v881_v57 = vsel %vm103_vm1, %v869_v53, %v878_v54  ;;  %v879_v58 = vrot.slane %v871_v55, 4  ;;  %v880_v60 = vrot.slane %v872_v56, 2 }
 0x34c   :  { %v883_v62 = vsel %vm882_vm12, %v879_v58, %v880_v60 }
 0x34d   :  { %v884_v1 = vsel %vm212_vm0, %v881_v57, %v883_v62 }
 0x34e   :  { %v886_v2 = vadd.f32 %v884_v1, %v873_v61 }
 0x350   :  { %v887_v40 = vfloor.f32 %v886_v2 }
 0x352   :  { %v888_v3 = vsub.f32 %v886_v2, %v887_v40  ;;  %v890_v4 = vadd.f32 1.0, %v887_v40  ;;  %vm891_vm13 = vcmp.ge.f32.partialorder %v887_v40, 0.0  ;;  %vm892_vm14 = vcmp.le.f32.partialorder %v887_v40, 7.0 }
 0x353   :  { %v899_v41 = vmax.f32 %v887_v40, 0.0  ;;  %vm893_vm15 = vmand %vm891_vm13, %vm892_vm14 }
 0x354   :  { %v889_v29 = vsub.f32 1.0, %v888_v3  ;;  %vm895_vm2 = vcmp.ge.f32.partialorder %v890_v4, 0.0  ;;  %vm896_vm4 = vcmp.le.f32.partialorder %v890_v4, 7.0  ;;  %v902_v59 = vmax.f32 %v890_v4, 0.0 }
 0x355   :  { %vm897_vm5 = vmand %vm895_vm2, %vm896_vm4  ;;  %v900_v38 = vmin.f32 %v899_v41, 7.0 }
 0x356   :  { %v1889_v5 = vsel %vm893_vm15, %v889_v29, 0.0  ;;  %v1891_v6 = vsel %vm897_vm5, %v888_v3, 0.0  ;;  %v903_v7 = vmin.f32 %v902_v59, 7.0 }
 0x357   :  { %v1893_v8 = vcvt.f32.s32 %v900_v38  ;;  %v983_v9 = vperm.slane %v1889_v5, 1  ;;  %v984_v10 = vperm.slane %v1889_v5, 3  ;;  %v985_v11 = vperm.slane %v1889_v5, 5 }
 0x358   :  { %vm1419_vm1 = vcmp.lt.s32.totalorder %v903_v7, 0  ;;  %v1420_v12 = vceil.f32 %v903_v7  ;;  %v1421_v13 = vfloor.f32 %v903_v7  ;;  %v986_v14 = vperm.slane %v1889_v5, 7 }
 0x359   :  { %v971_v39 = vperm.slane %v1893_v8, 1  ;;  %v972_v15 = vperm.slane %v1893_v8, 3  ;;  %v973_v44 = vperm.slane %v1893_v8, 5  ;;  %v974_v42 = vperm.slane %v1893_v8, 7 }
 0x35a   :  { %v1422_v16 = vsel %vm1419_vm1, %v1420_v12, %v1421_v13  ;;  %v991_v17 = vperm.slane %v983_v9, 1  ;;  %v992_v18 = vperm.slane %v984_v10, 1  ;;  %v993_v19 = vperm.slane %v985_v11, 1 }
 0x35b   :  { %v1903_v21 = vcvt.f32.s32 %v1422_v16  ;;  %v975_v22 = vperm.slane %v971_v39, 1  ;;  %v976_v23 = vperm.slane %v972_v15, 1  ;;  %v977_v24 = vperm.slane %v973_v44, 1 }
 0x35c   :  { %v978_v26 = vperm.slane %v974_v42, 1  ;;  %v994_v28 = vperm.slane %v986_v14, 1  ;;  %v1011_v30 = vperm.slane %v1891_v6, 1  ;;  %v1012_v25 = vperm.slane %v1891_v6, 3 }
 0x35d   :  { %vm979_vm6 = vcmp.eq.s32.totalorder %v1887_v20, %v975_v22  ;;  %vm980_vm7 = vcmp.eq.s32.totalorder %v1887_v20, %v976_v23  ;;  %vm981_vm8 = vcmp.eq.s32.totalorder %v1887_v20, %v977_v24  ;;  %v999_v31 = vperm.slane %v1903_v21, 1 }
 0x35e   :  { %vm982_vm9 = vcmp.eq.s32.totalorder %v1887_v20, %v978_v26  ;;  %v995_v0 = vsel %vm979_vm6, %v991_v17, 0.0  ;;  %v996_v33 = vsel %vm980_vm7, %v992_v18, 0.0  ;;  %v997_v34 = vsel %vm981_vm8, %v993_v19, 0.0 }
 0x35f   :  { %v998_v36 = vsel %vm982_vm9, %v994_v28, 0.0  ;;  %v1000_v37 = vperm.slane %v1903_v21, 3  ;;  %v1001_v43 = vperm.slane %v1903_v21, 5  ;;  %v1002_v27 = vperm.slane %v1903_v21, 7 }
 0x360   :  { %v1003_v63 = vperm.slane %v999_v31, 1  ;;  %v1013_v45 = vperm.slane %v1891_v6, 5  ;;  %v1014_v47 = vperm.slane %v1891_v6, 7  ;;  %v1019_v48 = vperm.slane %v1011_v30, 1 }
 0x361   :  { %v1004_v49 = vperm.slane %v1000_v37, 1  ;;  %v1005_v46 = vperm.slane %v1001_v43, 1  ;;  %v1006_v50 = vperm.slane %v1002_v27, 1  ;;  %v1020_v51 = vperm.slane %v1012_v25, 1 }
 0x362   :  { %vm1007_vm10 = vcmp.eq.s32.totalorder %v1887_v20, %v1003_v63  ;;  %v1021_v32 = vperm.slane %v1013_v45, 1  ;;  %v1022_v35 = vperm.slane %v1014_v47, 1  ;;  %v907_v52 = vperm.slane %v1893_v8, 0 }
 0x363   :  { %vm1008_vm11 = vcmp.eq.s32.totalorder %v1887_v20, %v1004_v49  ;;  %vm1009_vm12 = vcmp.eq.s32.totalorder %v1887_v20, %v1005_v46  ;;  %vm1010_vm13 = vcmp.eq.s32.totalorder %v1887_v20, %v1006_v50  ;;  %v1023_v53 = vsel %vm1007_vm10, %v1019_v48, 0.0  ;;  %v1413_v50 = vld [vmem:[%s2035_s1] sm:$0xff] }
 0x364   :  { %v1024_v54 = vsel %vm1008_vm11, %v1020_v51, 0.0  ;;  %v1025_v55 = vsel %vm1009_vm12, %v1021_v32, 0.0  ;;  %v1026_v56 = vsel %vm1010_vm13, %v1022_v35, 0.0  ;;  %v1922_v57 = vadd.f32 %v1023_v53, %v995_v0 }
 0x365   :  { %v1924_v58 = vadd.f32 %v1024_v54, %v996_v33  ;;  %v1926_v60 = vadd.f32 %v1025_v55, %v997_v34  ;;  %v1928_v61 = vadd.f32 %v1026_v56, %v998_v36  ;;  %v908_v62 = vperm.slane %v1893_v8, 2  ;;  %v1415_v55 = vld [vmem:[%s2035_s1 + $0x10] sm:$0xff]  ;;  %v1414_v56 = vld [vmem:[%s2035_s1 + $0x8] sm:$0xff] }
 0x366   :  { %v911_v1 = vperm.slane %v907_v52, 0  ;;  %v920_v2 = vperm.slane %v1889_v5, 0  ;;  %v921_v40 = vperm.slane %v1889_v5, 2  ;;  %v936_v3 = vperm.slane %v1903_v21, 0 }
 0x367   :  { %v912_v4 = vperm.slane %v908_v62, 0  ;;  %v937_v41 = vperm.slane %v1903_v21, 2  ;;  %v949_v29 = vperm.slane %v1891_v6, 0  ;;  %v950_v59 = vperm.slane %v1891_v6, 2  ;;  %v1416_v62 = vld [vmem:[%s2035_s1 + $0x18] sm:$0xff]  ;;  %s1581_s1 = smov [#allocation11]  }
 0x368   :  { %vm915_vm14 = vcmp.eq.s32.totalorder %v1887_v20, %v911_v1  ;;  %v928_v38 = vperm.slane %v920_v2, 0  ;;  %v929_v7 = vperm.slane %v921_v40, 0  ;;  %v940_v9 = vperm.slane %v936_v3, 0  ;;  %s1326_s20 = sshll.u32 %s1581_s1, 4  ;;  %s1327_s20 = int_to_ptr.vmem [resolvable:$true] %s1326_s20 }
 0x369   :  { %vm916_vm15 = vcmp.eq.s32.totalorder %v1887_v20, %v912_v4  ;;  %v941_v10 = vperm.slane %v937_v41, 0  ;;  %v957_v11 = vperm.slane %v949_v29, 0  ;;  %v958_v12 = vperm.slane %v950_v59, 0 }
 0x36a   :  { %v932_v13 = vsel %vm915_vm14, %v928_v38, 0.0  ;;  %v933_v14 = vsel %vm916_vm15, %v929_v7, 0.0  ;;  %vm944_vm2 = vcmp.eq.s32.totalorder %v1887_v20, %v940_v9  ;;  %v909_v39 = vperm.slane %v1893_v8, 4 }
 0x36b   :  { %vm945_vm4 = vcmp.eq.s32.totalorder %v1887_v20, %v941_v10  ;;  %v961_v15 = vsel %vm944_vm2, %v957_v11, 0.0  ;;  %v910_v44 = vperm.slane %v1893_v8, 6  ;;  %v922_v42 = vperm.slane %v1889_v5, 4 }
 0x36c   :  { %v962_v16 = vsel %vm945_vm4, %v958_v12, 0.0  ;;  %v965_v17 = vadd.f32 %v961_v15, %v932_v13  ;;  %v913_v18 = vperm.slane %v909_v39, 0  ;;  %v923_v19 = vperm.slane %v1889_v5, 6 }
 0x36d   :  { %v966_v22 = vadd.f32 %v962_v16, %v933_v14  ;;  %v914_v23 = vperm.slane %v910_v44, 0  ;;  %v938_v24 = vperm.slane %v1903_v21, 4  ;;  %v939_v26 = vperm.slane %v1903_v21, 6 }
 0x36e   :  { %v951_v28 = vperm.slane %v1891_v6, 4  ;;  %vm917_vm5 = vcmp.eq.s32.totalorder %v1887_v20, %v913_v18  ;;  %v930_v25 = vperm.slane %v922_v42, 0  ;;  %v931_v31 = vperm.slane %v923_v19, 0 }
 0x36f   :  { %v969_v30 = vpack.c.bf16 %v966_v22, %v965_v17  ;;  %v942_v8 = vperm.slane %v938_v24, 0  ;;  %v943_v0 = vperm.slane %v939_v26, 0  ;;  %v952_v33 = vperm.slane %v1891_v6, 6 }
 0x370   :  { %v959_v34 = vperm.slane %v951_v28, 0  ;;  %vm918_vm1 = vcmp.eq.s32.totalorder %v1887_v20, %v914_v23  ;;  %v934_v37 = vsel %vm917_vm5, %v930_v25, 0.0  ;;  %v1113_v38 = vperm.slane %v1924_v58, 3 }
 0x371   :  { %v1046_v36 = vunpack.c.l.b16 %v969_v30  ;;  %v1047_v5 = vunpack.c.h.b16 %v969_v30  ;;  %vm946_vm6 = vcmp.eq.s32.totalorder %v1887_v20, %v942_v8  ;;  %vm947_vm7 = vcmp.eq.s32.totalorder %v1887_v20, %v943_v0 }
 0x372   :  { %v960_v21 = vperm.slane %v952_v33, 0  ;;  %v963_v43 = vsel %vm946_vm6, %v959_v34, 0.0  ;;  %v935_v47 = vsel %vm918_vm1, %v931_v31, 0.0  ;;  %v1100_v7 = vperm.slane %v1922_v57, 0 }
 0x373   :  { %v1048_v27 = vpack.c.b16 %v1046_v36, %v1046_v36  ;;  %v1049_v63 = vpack.c.b16 %v1047_v5, %v1047_v5  ;;  %v967_v45 = vadd.f32 %v963_v43, %v934_v37  ;;  %v1104_v9 = vperm.slane %v1922_v57, 1 }
 0x374   :  { %v964_v48 = vsel %vm947_vm7, %v960_v21, 0.0  ;;  %v1101_v10 = vperm.slane %v1924_v58, 0  ;;  %v1105_v11 = vperm.slane %v1924_v58, 1  ;;  %v1245_v12 = vperm.slane %v1926_v60, 0 }
 0x375   :  { %v1057_v49 = vsel %vm212_vm0, %v1048_v27, 0  ;;  %v1060_v6 = vsel %vm212_vm0, %v1049_v63, 0  ;;  %v968_v46 = vadd.f32 %v964_v48, %v935_v47  ;;  %v1249_v13 = vperm.slane %v1926_v60, 1 }
 0x376   :  { %1069 = vmatpush.bf16.msra.mxu0 %v1057_v49  ;;  %1088 = vmatpush.bf16.msra.mxu1 %v1060_v6  ;;  %v1246_v39 = vperm.slane %v1928_v61, 0  ;;  %v1112_v15 = vperm.slane %v1922_v57, 3  ;;  %v1120_v44 = vperm.slane %v1922_v57, 5  ;;  %v1121_v42 = vperm.slane %v1924_v58, 5 }
 0x377   :  { %v970_v51 = vpack.c.bf16 %v968_v46, %v967_v45  ;;  %v1250_v18 = vperm.slane %v1928_v61, 1  ;;  %v1108_v19 = vperm.slane %v1922_v57, 2  ;;  %v1109_v23 = vperm.slane %v1924_v58, 2 }
 0x378   :  { %v1116_v8 = vperm.slane %v1922_v57, 4  ;;  %v1117_v31 = vperm.slane %v1924_v58, 4  ;;  %v1128_v0 = vperm.slane %v1922_v57, 7  ;;  %v1124_v36 = vperm.slane %v1922_v57, 6 }
 0x379   :  { %v1191_v20 = vunpack.c.l.b16 %v970_v51  ;;  %v1192_v32 = vunpack.c.h.b16 %v970_v51  ;;  %1392 = vmatmul.msk.bf16.vlgmr.msra.gmra.mxu0 %vm205_vm3, %v1413_v50  ;;  %1394 = vmatmul.msk.bf16.vlgmr.msra.gmra.mxu1 %vm205_vm3, %v1413_v50  ;;  %v1125_v37 = vperm.slane %v1924_v58, 6  ;;  %v1129_v21 = vperm.slane %v1924_v58, 7 }
 0x37a   :  { %v1258_v58 = vperm.slane %v1928_v61, 3 }
 0x37b   :  { %v1193_v35 = vpack.c.b16 %v1191_v20, %v1191_v20  ;;  %v1194_v52 = vpack.c.b16 %v1192_v32, %v1192_v32 }
 0x37d   :  { %v1202_v53 = vsel %vm212_vm0, %v1193_v35, 0  ;;  %v1205_v54 = vsel %vm212_vm0, %v1194_v52, 0 }
 0x37e   :  { %1214 = vmatpush.bf16.msra.mxu2 %v1202_v53  ;;  %1233 = vmatpush.bf16.msra.mxu3 %v1205_v54 }
 0x381   :  { %1404 = vmatmul.msk.bf16.vlgmr.msra.gmra.mxu2 %vm205_vm3, %v1415_v55  ;;  %1406 = vmatmul.msk.bf16.vlgmr.msra.gmra.mxu3 %vm205_vm3, %v1415_v55 }
 0x389   :  { %1393 = vmatmul.msk.bf16.gmra.mxu0 %vm205_vm3, %v1414_v56  ;;  %1395 = vmatmul.msk.bf16.gmra.mxu1 %vm205_vm3, %v1414_v56 }
 0x391   :  { %1405 = vmatmul.msk.bf16.gmra.mxu2 %vm205_vm3, %v1416_v62  ;;  %1407 = vmatmul.msk.bf16.gmra.mxu3 %vm205_vm3, %v1416_v62 }
 0x3f6   :  { %v1071_v1 = vpop.f32.mrf.mxu0  ;;  %v1090_v2 = vpop.f32.mrf.mxu1 }
 0x3f7   :  { %v1106_v16 = vmul.f32 %v1104_v9, %v1071_v1  ;;  %v1107_v17 = vmul.f32 %v1105_v11, %v1090_v2  ;;  %v1103_v33 = vmul.f32 %v1101_v10, %v1090_v2  ;;  %v1102_v53 = vmul.f32 %v1100_v7, %v1071_v1 }
 0x3f8   :  { %v1257_v11 = vperm.slane %v1926_v60, 3 }
 0x3f9   :  { %v1134_v43 = vrot.slane %v1106_v16, 4  ;;  %v1135_v27 = vrot.slane %v1107_v17, 4  ;;  %v1266_v16 = vperm.slane %v1928_v61, 5 }
 0x3fb   :  { %v1139_v54 = vadd.f32 %v1135_v27, %v1103_v33  ;;  %v1138_v10 = vadd.f32 %v1134_v43, %v1102_v53  ;;  %v1273_v33 = vperm.slane %v1926_v60, 7 }
 0x3fe   :  { %v1073_v40 = vpop.f32.mrf.mxu0  ;;  %v1092_v3 = vpop.f32.mrf.mxu1 }
 0x3ff   :  { %v1115_v14 = vmul.f32 %v1113_v38, %v1092_v3  ;;  %v1114_v22 = vmul.f32 %v1112_v15, %v1073_v40  ;;  %v1111_v63 = vmul.f32 %v1109_v23, %v1092_v3  ;;  %v1110_v46 = vmul.f32 %v1108_v19, %v1073_v40 }
 0x400   :  { %v1253_v40 = vperm.slane %v1926_v60, 2 }
 0x401   :  { %v1143_v25 = vrot.slane %v1115_v14, 4  ;;  %v1142_v47 = vrot.slane %v1114_v22, 4 }
 0x403   :  { %v1147_v50 = vadd.f32 %v1143_v25, %v1111_v63  ;;  %v1146_v56 = vadd.f32 %v1142_v47, %v1110_v46 }
 0x404   :  { %v1977_v4 = vpop.f32.mrf.mxu2  ;;  %v1979_v41 = vpop.f32.mrf.mxu3 }
 0x405   :  { %v1251_v15 = vmul.f32 %v1249_v13, %v1977_v4  ;;  %v1252_v17 = vmul.f32 %v1250_v18, %v1979_v41  ;;  %v1164_v19 = vadd.f32 %v1146_v56, %v1138_v10  ;;  %v1248_v18 = vmul.f32 %v1246_v39, %v1979_v41 }
 0x406   :  { %v1076_v29 = vpop.f32.mrf.mxu0  ;;  %v1095_v59 = vpop.f32.mrf.mxu1 }
 0x407   :  { %v1122_v28 = vmul.f32 %v1120_v44, %v1076_v29  ;;  %v1123_v30 = vmul.f32 %v1121_v42, %v1095_v59  ;;  %v1118_v32 = vmul.f32 %v1116_v8, %v1076_v29  ;;  %v1119_v35 = vmul.f32 %v1117_v31, %v1095_v59 }
 0x408   :  { %v1254_v29 = vperm.slane %v1928_v61, 2  ;;  %v1165_v59 = vadd.f32 %v1147_v50, %v1139_v54  ;;  %v1261_v44 = vperm.slane %v1926_v60, 4  ;;  %v1265_v42 = vperm.slane %v1926_v60, 5 }
 0x409   :  { %v1150_v48 = vrot.slane %v1122_v28, 4  ;;  %v1151_v49 = vrot.slane %v1123_v30, 4  ;;  %v1262_v30 = vperm.slane %v1928_v61, 4  ;;  %v1269_v8 = vperm.slane %v1926_v60, 6 }
 0x40b   :  { %v1154_v62 = vadd.f32 %v1150_v48, %v1118_v32  ;;  %v1155_v2 = vadd.f32 %v1151_v49, %v1119_v35 }
 0x40c   :  { %v1995_v24 = vpop.f32.mrf.mxu2  ;;  %v1997_v26 = vpop.f32.mrf.mxu3 }
 0x40d   :  { %v1260_v1 = vmul.f32 %v1258_v58, %v1997_v26  ;;  %v1259_v22 = vmul.f32 %v1257_v11, %v1995_v24  ;;  %v1256_v43 = vmul.f32 %v1254_v29, %v1997_v26  ;;  %v1255_v46 = vmul.f32 %v1253_v40, %v1995_v24 }
 0x40e   :  { %v1078_v34 = vpop.f32.mrf.mxu0  ;;  %v1097_v5 = vpop.f32.mrf.mxu1  ;;  %v1247_v26 = vmul.f32 %v1245_v12, %v1977_v4 }
 0x40f   :  { %v1130_v45 = vmul.f32 %v1128_v0, %v1078_v34  ;;  %v1131_v6 = vmul.f32 %v1129_v21, %v1097_v5  ;;  %v1126_v51 = vmul.f32 %v1124_v36, %v1078_v34  ;;  %v1127_v57 = vmul.f32 %v1125_v37, %v1097_v5 }
 0x410   :  { %v1288_v31 = vrot.slane %v1260_v1, 4  ;;  %v1279_v34 = vrot.slane %v1251_v15, 4  ;;  %v1270_v36 = vperm.slane %v1928_v61, 6  ;;  %v1274_v5 = vperm.slane %v1928_v61, 7 }
 0x411   :  { %v1158_v20 = vrot.slane %v1130_v45, 4  ;;  %v1159_v52 = vrot.slane %v1131_v6, 4  ;;  %v1280_v37 = vrot.slane %v1252_v17, 4  ;;  %v1287_v21 = vrot.slane %v1259_v22, 4 }
 0x412   :  { %v1292_v41 = vadd.f32 %v1288_v31, %v1256_v43 }
 0x413   :  { %v1162_v55 = vadd.f32 %v1158_v20, %v1126_v51  ;;  %v1163_v9 = vadd.f32 %v1159_v52, %v1127_v57  ;;  %v1284_v35 = vadd.f32 %v1280_v37, %v1248_v18  ;;  %v1291_v57 = vadd.f32 %v1287_v21, %v1255_v46 }
 0x414   :  { %v1221_v3 = vpop.f32.mrf.mxu2  ;;  %v1240_v38 = vpop.f32.mrf.mxu3 }
 0x415   :  { %v1166_v7 = vadd.f32 %v1162_v55, %v1154_v62  ;;  %v1167_v14 = vadd.f32 %v1163_v9, %v1155_v2  ;;  %v1267_v28 = vmul.f32 %v1265_v42, %v1221_v3  ;;  %v1268_v25 = vmul.f32 %v1266_v16, %v1240_v38 }
 0x416   :  { %v1263_v39 = vmul.f32 %v1261_v44, %v1221_v3  ;;  %v1264_v50 = vmul.f32 %v1262_v30, %v1240_v38  ;;  %v1283_v55 = vadd.f32 %v1279_v34, %v1247_v26  ;;  %v1310_v56 = vadd.f32 %v1292_v41, %v1284_v35 }
 0x417   :  { %v1169_v23 = vadd.f32 %v1167_v14, %v1165_v59  ;;  %v1168_v13 = vadd.f32 %v1166_v7, %v1164_v19  ;;  %v1295_v47 = vrot.slane %v1267_v28, 4  ;;  %v1296_v48 = vrot.slane %v1268_v25, 4 }
 0x418   :  { %v1309_v2 = vadd.f32 %v1291_v57, %v1283_v55 }
 0x419   :  { %v1172_v0 = vrot.slane %v1169_v23, 4  ;;  %v1299_v52 = vadd.f32 %v1295_v47, %v1263_v39  ;;  %v1300_v53 = vadd.f32 %v1296_v48, %v1264_v50 }
 0x41b   :  { %v1173_v45 = vsel %vm212_vm0, %v1168_v13, %v1172_v0 }
 0x41c   :  { %v1223_v27 = vpop.f32.mrf.mxu2  ;;  %v1242_v63 = vpop.f32.mrf.mxu3  ;;  %1175 = vst [vmem:[#allocation11] sm:$0xff] %v1173_v45 }
 0x41d   :  { %v1275_v49 = vmul.f32 %v1273_v33, %v1223_v27  ;;  %v1276_v6 = vmul.f32 %v1274_v5, %v1242_v63  ;;  %v1271_v51 = vmul.f32 %v1269_v8, %v1223_v27  ;;  %v1272_v20 = vmul.f32 %v1270_v36, %v1242_v63 }
 0x41f   :  { %v1303_v61 = vrot.slane %v1275_v49, 4  ;;  %v1304_v32 = vrot.slane %v1276_v6, 4 }
 0x421   :  { %v1307_v54 = vadd.f32 %v1303_v61, %v1271_v51  ;;  %v1308_v58 = vadd.f32 %v1304_v32, %v1272_v20 }
 0x423   :  { %v1311_v24 = vadd.f32 %v1307_v54, %v1299_v52  ;;  %v1312_v62 = vadd.f32 %v1308_v58, %v1300_v53 }
 0x425   :  { %v1314_v3 = vadd.f32 %v1312_v62, %v1310_v56  ;;  %v1313_v60 = vadd.f32 %v1311_v24, %v1309_v2 }
 0x427   :  { %v1317_v4 = vrot.slane %v1314_v3, 4 }
 0x429   :  { %v1318_v12 = vsel %vm212_vm0, %v1313_v60, %v1317_v4 }
 0x42a   :  { %1320 = vst [vmem:[#allocation11 + $0x8] sm:$0xff] %v1318_v12 }
 0x42b   :  { %1331 = dma.vmem_to_hbm [thread:$0]  %s1327_s20, 256, %s1329_s22, [#allocation5]  }
 0x42c   :  { %1565 = dma.done.wait [#allocation5], 256  }
 0x42d   :  { %1566 = vsyncadd [#allocation5], 4294967040 }
 0x42e   :  { %1336 = vsyncpa [#allocation4], 1 }
 0x42f   :  { %1337 = vsyncpa [#allocation7], 1 }
 0x430   :  { %1338 = vsyncpa [#allocation10], 1 }
 0x431   :  { %1339 = vsyncpa [#allocation5], 1 }

</bundles_post_ra>
